<compile_context>
chip_gen: v6e
topology: v6e:2x2x1
jax: 0.10.0
libtpu: 0.0.40
codegen_flags: <defaults>
</compile_context>

<pallas_src>
import math

import jax
import jax.numpy as jnp
from jax.experimental import pallas as pl
from jax.experimental.pallas import tpu as pltpu

# ----------------------------- config (small) -----------------------------
VOCAB_SIZE = 32
HIDDEN = 32
N_LAYERS = 2
N_HEADS = 4
HEAD_DIM = HIDDEN // N_HEADS
INTERMEDIATE = 64
MAX_POS = 16
EPS = 1e-12          # BERT/HF-style layer_norm_eps (reference config value)
PAD_ID = 0

BATCH = 2
SEQ = 8


# ----------------------------- kernel helpers -----------------------------
def _layer_norm(x, gamma, beta):
    mean = jnp.mean(x, axis=-1, keepdims=True)
    var = jnp.mean((x - mean) ** 2, axis=-1, keepdims=True)
    return (x - mean) * jax.lax.rsqrt(var + EPS) * gamma + beta


def _erf(x):
    # Abramowitz & Stegun 7.1.26 polynomial (max abs err ~1.5e-7): matches
    # torch's exact-erf GELU to f32 tolerance using only VPU/EUP ops.
    p = 0.3275911
    a1, a2, a3, a4, a5 = 0.254829592, -0.284496736, 1.421413741, -1.453152027, 1.061405429
    sign = jnp.where(x >= 0.0, 1.0, -1.0)
    ax = jnp.abs(x)
    t = 1.0 / (1.0 + p * ax)
    poly = ((((a5 * t + a4) * t + a3) * t + a2) * t + a1) * t
    return sign * (1.0 - poly * jnp.exp(-ax * ax))


def _gelu_exact(x):
    return 0.5 * x * (1.0 + _erf(x * (1.0 / math.sqrt(2.0))))


# ---------------------- fully fused transformer kernel ----------------------
def transformer_kernel(ids_ref, mask_ref, wemb_ref, pemb_ref, eg_ref, eb_ref,
                       wqkv_ref, bqkv_ref, wo_ref, bo_ref, ln1g_ref, ln1b_ref,
                       w1_ref, b1_ref, w2_ref, b2_ref, ln2g_ref, ln2b_ref,
                       fg_ref, fb_ref, out_ref, probs_ref):
    B, S, H, NH, HD = BATCH, SEQ, HIDDEN, N_HEADS, HEAD_DIM
    N = B * S
    HB = NH * B

    # ---- embeddings: 2-D one-hot gather (tables resident in VMEM) ----
    ids = ids_ref[...]                                                   # (N, 1) i32
    iota = jax.lax.broadcasted_iota(jnp.int32, (N, VOCAB_SIZE), 1)
    onehot = (ids == iota).astype(jnp.float32)                           # (N, V)
    wemb = jnp.dot(onehot, wemb_ref[...], preferred_element_type=jnp.float32)
    pemb = jnp.tile(pemb_ref[0:S, :], (B, 1))                            # (N, H)
    x = _layer_norm(wemb + pemb, eg_ref[...], eb_ref[...])               # (N, H)
    # dropout: identity (eval mode)

    # ---- additive key mask, hoisted once, head-batched: (NH*B, 1, S) ----
    add_mask = (1.0 - mask_ref[...]) * -10000.0                          # (B, S)
    add_mask_hb = jnp.broadcast_to(add_mask[None, :, None, :],
                                   (NH, B, 1, S)).reshape(HB, 1, S)

    scale = 1.0 / math.sqrt(HD)

    def split_heads(qkv, base):
        """Fused (N, 3H) qkv -> (NH*B, S, HD) slab, combined batch index h*B+b."""
        hs = jnp.stack([qkv[:, base + h * HD: base + (h + 1) * HD]
                        for h in range(NH)], axis=0)                     # (NH, N, HD)
        return hs.reshape(HB, S, HD)

    for l in range(N_LAYERS):
        # Fused QKV: ONE (N,H)@(H,3H) matmul + ONE bias add.
        qkv = jnp.dot(x, wqkv_ref[l], preferred_element_type=jnp.float32) + bqkv_ref[l]

        qh = split_heads(qkv, 0) * scale                                 # (HB, S, HD)
        kh = split_heads(qkv, H)
        vh = split_heads(qkv, 2 * H)

        # All heads batched: one score einsum + ONE softmax per layer.
        scores = jnp.einsum('bqd,bkd->bqk', qh, kh,
                            preferred_element_type=jnp.float32) + add_mask_hb
        smax = jnp.max(scores, axis=-1, keepdims=True)
        e = jnp.exp(scores - smax)
        denom = jnp.sum(e, axis=-1, keepdims=True)
        probs = e * pl.reciprocal(denom, approx=True)                    # (HB, S, S)

        # Direct per-layer store, no jnp.stack relayout.
        probs_ref[l] = probs

        ctx = jnp.einsum('bqk,bkd->bqd', probs, vh,
                         preferred_element_type=jnp.float32)             # (HB, S, HD)

        # Head-concat + output projection fused as one head-batched einsum + sum.
        parts = jnp.einsum('hnd,hdo->hno',
                           ctx.reshape(NH, N, HD),
                           wo_ref[l].reshape(NH, HD, H),
                           preferred_element_type=jnp.float32)           # (NH, N, H)
        attn_out = jnp.sum(parts, axis=0) + bo_ref[l]

        x = _layer_norm(x + attn_out, ln1g_ref[l], ln1b_ref[l])

        # Feed-forward with exact-erf GELU.
        ff = jnp.dot(x, w1_ref[l], preferred_element_type=jnp.float32) + b1_ref[l]
        ff = _gelu_exact(ff)
        ff = jnp.dot(ff, w2_ref[l], preferred_element_type=jnp.float32) + b2_ref[l]
        x = _layer_norm(x + ff, ln2g_ref[l], ln2b_ref[l])

    # ---- final LayerNorm + flat 2-D store ----
    x = _layer_norm(x, fg_ref[...], fb_ref[...])
    out_ref[...] = x                                                     # (N, H)


# ------------------------------ host wrapper ------------------------------
def transformer_forward(params, input_ids, attention_mask):
    B, S = input_ids.shape
    N = B * S
    ids2d = input_ids.reshape(N, 1).astype(jnp.int32)
    mask_f = attention_mask.astype(jnp.float32)

    inputs = [
        ids2d, mask_f,
        params["word_embeddings"], params["position_embeddings"],
        params["emb_ln_g"], params["emb_ln_b"],
        params["wqkv"], params["bqkv"], params["wo"], params["bo"],
        params["ln1g"], params["ln1b"], params["w1"], params["b1"],
        params["w2"], params["b2"], params["ln2g"], params["ln2b"],
        params["final_ln_g"], params["final_ln_b"],
    ]

    out_shape = (
        jax.ShapeDtypeStruct((N, HIDDEN), jnp.float32),
        jax.ShapeDtypeStruct((N_LAYERS, N_HEADS * B, S, S), jnp.float32),
    )

    # Advisory cost estimate (flops / transcendentals / bytes).
    flops = 2 * N * VOCAB_SIZE * HIDDEN + N_LAYERS * (
        2 * N * HIDDEN * 3 * HIDDEN
        + 2 * (2 * (B * N_HEADS) * S * S * HEAD_DIM)
        + 2 * N * HIDDEN * HIDDEN
        + 2 * (2 * N * HIDDEN * INTERMEDIATE))
    transcendentals = N_LAYERS * (B * N_HEADS * S * S + N * INTERMEDIATE)
    bytes_accessed = (sum(int(a.size) * a.dtype.itemsize for a in inputs)
                      + N * HIDDEN * 4 + N_LAYERS * N_HEADS * B * S * S * 4)

    vmem_spec = pl.BlockSpec(memory_space=pltpu.MemorySpace.VMEM)

    hidden_flat, probs_packed = pl.pallas_call(
        transformer_kernel,
        out_shape=out_shape,
        in_specs=[vmem_spec] * len(inputs),
        out_specs=(vmem_spec, vmem_spec),
        cost_estimate=pl.CostEstimate(flops=flops,
                                      transcendentals=transcendentals,
                                      bytes_accessed=bytes_accessed),
    )(*inputs)

    hidden = hidden_flat.reshape(B, S, HIDDEN)
    # (L, NH*B, S, S) with batch index h*B+b -> (L, B, NH, S, S), matching
    # torch.stack(all_attention_probs).
    attn_probs = probs_packed.reshape(N_LAYERS, N_HEADS, B, S, S).transpose(0, 2, 1, 3, 4)
    return hidden, attn_probs


# ------------------------------ parameter init ------------------------------
def init_params(key):
    def normal(k, shape):
        return jax.random.normal(k, shape, jnp.float32) * 0.02

    keys = jax.random.split(key, 2 + 6 * N_LAYERS)
    it = iter(keys)

    word_emb = normal(next(it), (VOCAB_SIZE, HIDDEN)).at[PAD_ID].set(0.0)  # padding_idx init
    pos_emb = normal(next(it), (MAX_POS, HIDDEN))

    wqkv, wo, w1, w2 = [], [], [], []
    for _ in range(N_LAYERS):
        wq = normal(next(it), (HIDDEN, HIDDEN))
        wk = normal(next(it), (HIDDEN, HIDDEN))
        wv = normal(next(it), (HIDDEN, HIDDEN))
        wqkv.append(jnp.concatenate([wq, wk, wv], axis=1))   # fused (H, 3H)
        wo.append(normal(next(it), (HIDDEN, HIDDEN)))
        w1.append(normal(next(it), (HIDDEN, INTERMEDIATE)))
        w2.append(normal(next(it), (INTERMEDIATE, HIDDEN)))

    L = N_LAYERS
    return {
        "word_embeddings": word_emb,
        "position_embeddings": pos_emb,
        "emb_ln_g": jnp.ones((1, HIDDEN), jnp.float32),
        "emb_ln_b": jnp.zeros((1, HIDDEN), jnp.float32),
        "final_ln_g": jnp.ones((1, HIDDEN), jnp.float32),
        "final_ln_b": jnp.zeros((1, HIDDEN), jnp.float32),
        # stacked per-layer weights: leading axis = layer
        "wqkv": jnp.stack(wqkv), "bqkv": jnp.zeros((L, 1, 3 * HIDDEN), jnp.float32),
        "wo": jnp.stack(wo), "bo": jnp.zeros((L, 1, HIDDEN), jnp.float32),
        "ln1g": jnp.ones((L, 1, HIDDEN), jnp.float32),
        "ln1b": jnp.zeros((L, 1, HIDDEN), jnp.float32),
        "w1": jnp.stack(w1), "b1": jnp.zeros((L, 1, INTERMEDIATE), jnp.float32),
        "w2": jnp.stack(w2), "b2": jnp.zeros((L, 1, HIDDEN), jnp.float32),
        "ln2g": jnp.ones((L, 1, HIDDEN), jnp.float32),
        "ln2b": jnp.zeros((L, 1, HIDDEN), jnp.float32),
    }


# ----------------------------------- main -----------------------------------
if __name__ == "__main__":
    key = jax.random.PRNGKey(0)
    pkey, dkey = jax.random.split(key)
    params = init_params(pkey)

    input_ids = jax.random.randint(dkey, (BATCH, SEQ), 1, VOCAB_SIZE, dtype=jnp.int32)
    attention_mask = jnp.ones((BATCH, SEQ), jnp.int32)
    attention_mask = attention_mask.at[1, SEQ - 2:].set(0)  # mask last 2 tokens of row 1

    fwd = jax.jit(transformer_forward)
    hidden, attn_probs = fwd(params, input_ids, attention_mask)
    jax.block_until_ready((hidden, attn_probs))

    assert hidden.shape == (BATCH, SEQ, HIDDEN)
    assert attn_probs.shape == (N_LAYERS, BATCH, N_HEADS, SEQ, SEQ)
    assert bool(jnp.all(jnp.isfinite(hidden)))
    assert bool(jnp.all(jnp.isfinite(attn_probs)))
    print("KERNEL_OK")
</pallas_src>

<mosaic_0001>
module attributes {stable_mosaic.version = 11 : i64} {
  func.func @transformer_kernel(%arg0: memref<16x1xi32, #tpu.memory_space<vmem>>, %arg1: memref<2x8xf32, #tpu.memory_space<vmem>>, %arg2: memref<32x32xf32, #tpu.memory_space<vmem>>, %arg3: memref<16x32xf32, #tpu.memory_space<vmem>>, %arg4: memref<1x32xf32, #tpu.memory_space<vmem>>, %arg5: memref<1x32xf32, #tpu.memory_space<vmem>>, %arg6: memref<2x32x96xf32, #tpu.memory_space<vmem>>, %arg7: memref<2x1x96xf32, #tpu.memory_space<vmem>>, %arg8: memref<2x32x32xf32, #tpu.memory_space<vmem>>, %arg9: memref<2x1x32xf32, #tpu.memory_space<vmem>>, %arg10: memref<2x1x32xf32, #tpu.memory_space<vmem>>, %arg11: memref<2x1x32xf32, #tpu.memory_space<vmem>>, %arg12: memref<2x32x64xf32, #tpu.memory_space<vmem>>, %arg13: memref<2x1x64xf32, #tpu.memory_space<vmem>>, %arg14: memref<2x64x32xf32, #tpu.memory_space<vmem>>, %arg15: memref<2x1x32xf32, #tpu.memory_space<vmem>>, %arg16: memref<2x1x32xf32, #tpu.memory_space<vmem>>, %arg17: memref<2x1x32xf32, #tpu.memory_space<vmem>>, %arg18: memref<1x32xf32, #tpu.memory_space<vmem>>, %arg19: memref<1x32xf32, #tpu.memory_space<vmem>>, %arg20: memref<16x32xf32, #tpu.memory_space<vmem>>, %arg21: memref<2x8x8x8xf32, #tpu.memory_space<vmem>>) attributes {dimension_semantics = [], scalar_prefetch = 0 : i64, scratch_operands = 0 : i64, tpu.core_type = #tpu.core_type<tc>} {
    %c0 = arith.constant 0 : index
    %c0_0 = arith.constant 0 : index
    %0 = vector.load %arg0[%c0, %c0_0] : memref<16x1xi32, #tpu.memory_space<vmem>>, vector<16x1xi32>
    %1 = tpu.iota {dimensions = array<i32: 1>} : vector<16x32xi32>
    %2 = vector.broadcast %0 : vector<16x1xi32> to vector<16x32xi32>
    %3 = arith.cmpi eq, %2, %1 : vector<16x32xi32>
    %4 = arith.extui %3 : vector<16x32xi1> to vector<16x32xi32>
    %5 = arith.sitofp %4 : vector<16x32xi32> to vector<16x32xf32>
    %c0_1 = arith.constant 0 : index
    %c0_2 = arith.constant 0 : index
    %6 = vector.load %arg2[%c0_1, %c0_2] : memref<32x32xf32, #tpu.memory_space<vmem>>, vector<32x32xf32>
    %cst = arith.constant dense<0.000000e+00> : vector<16x32xf32>
    %7 = tpu.matmul %5, %6, %cst {dimension_numbers = #tpu.dot_dimension_numbers<[1], [0], [0], [1], [0, 0, 1, 1], [], []>} : vector<16x32xf32>, vector<32x32xf32>, vector<16x32xf32> -> vector<16x32xf32>
    %c0_3 = arith.constant 0 : index
    %c0_4 = arith.constant 0 : index
    %8 = vector.load %arg3[%c0_3, %c0_4] : memref<16x32xf32, #tpu.memory_space<vmem>>, vector<8x32xf32>
    %9 = tpu.concatenate %8, %8 in 0 : vector<8x32xf32>, vector<8x32xf32> -> vector<16x32xf32>
    %10 = arith.addf %7, %9 : vector<16x32xf32>
    %c0_5 = arith.constant 0 : index
    %c0_6 = arith.constant 0 : index
    %11 = vector.load %arg4[%c0_5, %c0_6] : memref<1x32xf32, #tpu.memory_space<vmem>>, vector<1x32xf32>
    %c0_7 = arith.constant 0 : index
    %c0_8 = arith.constant 0 : index
    %12 = vector.load %arg5[%c0_7, %c0_8] : memref<1x32xf32, #tpu.memory_space<vmem>>, vector<1x32xf32>
    %cst_9 = arith.constant dense<0.000000e+00> : vector<16xf32>
    %13 = vector.multi_reduction <add>, %10, %cst_9 [1] : vector<16x32xf32> to vector<16xf32>
    %14 = vector.shape_cast %13 : vector<16xf32> to vector<16x1xf32>
    %cst_10 = arith.constant 3.200000e+01 : f32
    %15 = vector.broadcast %cst_10 : f32 to vector<16x1xf32>
    %16 = arith.divf %14, %15 : vector<16x1xf32>
    %17 = vector.broadcast %16 : vector<16x1xf32> to vector<16x32xf32>
    %18 = arith.subf %10, %17 : vector<16x32xf32>
    %19 = arith.mulf %18, %18 : vector<16x32xf32>
    %cst_11 = arith.constant dense<0.000000e+00> : vector<16xf32>
    %20 = vector.multi_reduction <add>, %19, %cst_11 [1] : vector<16x32xf32> to vector<16xf32>
    %21 = vector.shape_cast %20 : vector<16xf32> to vector<16x1xf32>
    %cst_12 = arith.constant 3.200000e+01 : f32
    %22 = vector.broadcast %cst_12 : f32 to vector<16x1xf32>
    %23 = arith.divf %21, %22 : vector<16x1xf32>
    %24 = vector.broadcast %16 : vector<16x1xf32> to vector<16x32xf32>
    %25 = arith.subf %10, %24 : vector<16x32xf32>
    %cst_13 = arith.constant 9.99999996E-13 : f32
    %26 = vector.broadcast %cst_13 : f32 to vector<16x1xf32>
    %27 = arith.addf %23, %26 : vector<16x1xf32>
    %28 = math.rsqrt %27 : vector<16x1xf32>
    %29 = vector.broadcast %28 : vector<16x1xf32> to vector<16x32xf32>
    %30 = arith.mulf %25, %29 : vector<16x32xf32>
    %31 = vector.broadcast %11 : vector<1x32xf32> to vector<16x32xf32>
    %32 = arith.mulf %30, %31 : vector<16x32xf32>
    %33 = vector.broadcast %12 : vector<1x32xf32> to vector<16x32xf32>
    %34 = arith.addf %32, %33 : vector<16x32xf32>
    %c0_14 = arith.constant 0 : index
    %c0_15 = arith.constant 0 : index
    %35 = vector.load %arg1[%c0_14, %c0_15] : memref<2x8xf32, #tpu.memory_space<vmem>>, vector<2x8xf32>
    %cst_16 = arith.constant 1.000000e+00 : f32
    %36 = vector.broadcast %cst_16 : f32 to vector<2x8xf32>
    %37 = arith.subf %36, %35 : vector<2x8xf32>
    %cst_17 = arith.constant -1.000000e+04 : f32
    %38 = vector.broadcast %cst_17 : f32 to vector<2x8xf32>
    %39 = arith.mulf %37, %38 : vector<2x8xf32>
    %40 = vector.shape_cast %39 : vector<2x8xf32> to vector<1x2x1x8xf32>
    %41 = vector.shape_cast %40 : vector<1x2x1x8xf32> to vector<1x2x1x8xf32>
    %42 = vector.broadcast %41 : vector<1x2x1x8xf32> to vector<4x2x1x8xf32>
    %43 = vector.shape_cast %42 : vector<4x2x1x8xf32> to vector<8x1x8xf32>
    %c0_18 = arith.constant 0 : index
    %c0_19 = arith.constant 0 : index
    %c0_20 = arith.constant 0 : index
    %44 = vector.load %arg6[%c0_18, %c0_19, %c0_20] : memref<2x32x96xf32, #tpu.memory_space<vmem>>, vector<1x32x96xf32>
    %45 = vector.shape_cast %44 : vector<1x32x96xf32> to vector<32x96xf32>
    %cst_21 = arith.constant dense<0.000000e+00> : vector<16x96xf32>
    %46 = tpu.matmul %34, %45, %cst_21 {dimension_numbers = #tpu.dot_dimension_numbers<[1], [0], [0], [1], [0, 0, 1, 1], [], []>} : vector<16x32xf32>, vector<32x96xf32>, vector<16x96xf32> -> vector<16x96xf32>
    %c0_22 = arith.constant 0 : index
    %c0_23 = arith.constant 0 : index
    %c0_24 = arith.constant 0 : index
    %47 = vector.load %arg7[%c0_22, %c0_23, %c0_24] : memref<2x1x96xf32, #tpu.memory_space<vmem>>, vector<1x1x96xf32>
    %48 = vector.shape_cast %47 : vector<1x1x96xf32> to vector<1x96xf32>
    %49 = vector.broadcast %48 : vector<1x96xf32> to vector<16x96xf32>
    %50 = arith.addf %46, %49 : vector<16x96xf32>
    %51 = vector.extract_strided_slice %50 {offsets = [0, 0], sizes = [16, 8], strides = [1, 1]} : vector<16x96xf32> to vector<16x8xf32>
    %52 = vector.extract_strided_slice %50 {offsets = [0, 8], sizes = [16, 8], strides = [1, 1]} : vector<16x96xf32> to vector<16x8xf32>
    %53 = vector.extract_strided_slice %50 {offsets = [0, 16], sizes = [16, 8], strides = [1, 1]} : vector<16x96xf32> to vector<16x8xf32>
    %54 = vector.extract_strided_slice %50 {offsets = [0, 24], sizes = [16, 8], strides = [1, 1]} : vector<16x96xf32> to vector<16x8xf32>
    %55 = vector.shape_cast %51 : vector<16x8xf32> to vector<1x16x8xf32>
    %56 = vector.shape_cast %52 : vector<16x8xf32> to vector<1x16x8xf32>
    %57 = vector.shape_cast %53 : vector<16x8xf32> to vector<1x16x8xf32>
    %58 = vector.shape_cast %54 : vector<16x8xf32> to vector<1x16x8xf32>
    %59 = tpu.concatenate %55, %56, %57, %58 in 0 : vector<1x16x8xf32>, vector<1x16x8xf32>, vector<1x16x8xf32>, vector<1x16x8xf32> -> vector<4x16x8xf32>
    %60 = vector.shape_cast %59 : vector<4x16x8xf32> to vector<8x8x8xf32>
    %cst_25 = arith.constant 0.353553385 : f32
    %61 = vector.broadcast %cst_25 : f32 to vector<8x8x8xf32>
    %62 = arith.mulf %60, %61 : vector<8x8x8xf32>
    %63 = vector.extract_strided_slice %50 {offsets = [0, 32], sizes = [16, 8], strides = [1, 1]} : vector<16x96xf32> to vector<16x8xf32>
    %64 = vector.extract_strided_slice %50 {offsets = [0, 40], sizes = [16, 8], strides = [1, 1]} : vector<16x96xf32> to vector<16x8xf32>
    %65 = vector.extract_strided_slice %50 {offsets = [0, 48], sizes = [16, 8], strides = [1, 1]} : vector<16x96xf32> to vector<16x8xf32>
    %66 = vector.extract_strided_slice %50 {offsets = [0, 56], sizes = [16, 8], strides = [1, 1]} : vector<16x96xf32> to vector<16x8xf32>
    %67 = vector.shape_cast %63 : vector<16x8xf32> to vector<1x16x8xf32>
    %68 = vector.shape_cast %64 : vector<16x8xf32> to vector<1x16x8xf32>
    %69 = vector.shape_cast %65 : vector<16x8xf32> to vector<1x16x8xf32>
    %70 = vector.shape_cast %66 : vector<16x8xf32> to vector<1x16x8xf32>
    %71 = tpu.concatenate %67, %68, %69, %70 in 0 : vector<1x16x8xf32>, vector<1x16x8xf32>, vector<1x16x8xf32>, vector<1x16x8xf32> -> vector<4x16x8xf32>
    %72 = vector.shape_cast %71 : vector<4x16x8xf32> to vector<8x8x8xf32>
    %73 = vector.extract_strided_slice %50 {offsets = [0, 64], sizes = [16, 8], strides = [1, 1]} : vector<16x96xf32> to vector<16x8xf32>
    %74 = vector.extract_strided_slice %50 {offsets = [0, 72], sizes = [16, 8], strides = [1, 1]} : vector<16x96xf32> to vector<16x8xf32>
    %75 = vector.extract_strided_slice %50 {offsets = [0, 80], sizes = [16, 8], strides = [1, 1]} : vector<16x96xf32> to vector<16x8xf32>
    %76 = vector.extract_strided_slice %50 {offsets = [0, 88], sizes = [16, 8], strides = [1, 1]} : vector<16x96xf32> to vector<16x8xf32>
    %77 = vector.shape_cast %73 : vector<16x8xf32> to vector<1x16x8xf32>
    %78 = vector.shape_cast %74 : vector<16x8xf32> to vector<1x16x8xf32>
    %79 = vector.shape_cast %75 : vector<16x8xf32> to vector<1x16x8xf32>
    %80 = vector.shape_cast %76 : vector<16x8xf32> to vector<1x16x8xf32>
    %81 = tpu.concatenate %77, %78, %79, %80 in 0 : vector<1x16x8xf32>, vector<1x16x8xf32>, vector<1x16x8xf32>, vector<1x16x8xf32> -> vector<4x16x8xf32>
    %82 = vector.shape_cast %81 : vector<4x16x8xf32> to vector<8x8x8xf32>
    "tpu.trace_start"() <{level = 10 : i32, message = "bqd,bkd->bqk"}> : () -> ()
    %cst_26 = arith.constant dense<0.000000e+00> : vector<8x8x8xf32>
    %83 = tpu.matmul %62, %72, %cst_26 {dimension_numbers = #tpu.dot_dimension_numbers<[2], [2], [1], [1], [0, 0, 0, 1, 1, 1], [0], [0]>} : vector<8x8x8xf32>, vector<8x8x8xf32>, vector<8x8x8xf32> -> vector<8x8x8xf32>
    "tpu.trace_stop"() : () -> ()
    %84 = vector.broadcast %43 : vector<8x1x8xf32> to vector<8x8x8xf32>
    %85 = arith.addf %83, %84 : vector<8x8x8xf32>
    %cst_27 = arith.constant dense<0xFF800000> : vector<8x8xf32>
    %86 = vector.multi_reduction <maximumf>, %85, %cst_27 [2] : vector<8x8x8xf32> to vector<8x8xf32>
    %87 = vector.shape_cast %86 : vector<8x8xf32> to vector<8x8x1xf32>
    %88 = vector.broadcast %87 : vector<8x8x1xf32> to vector<8x8x8xf32>
    %89 = arith.subf %85, %88 : vector<8x8x8xf32>
    %90 = math.exp %89 : vector<8x8x8xf32>
    %cst_28 = arith.constant dense<0.000000e+00> : vector<8x8xf32>
    %91 = vector.multi_reduction <add>, %90, %cst_28 [2] : vector<8x8x8xf32> to vector<8x8xf32>
    %92 = vector.shape_cast %91 : vector<8x8xf32> to vector<8x8x1xf32>
    %93 = tpu.reciprocal %92 {approx = true} : vector<8x8x1xf32> -> vector<8x8x1xf32>
    %94 = vector.broadcast %93 : vector<8x8x1xf32> to vector<8x8x8xf32>
    %95 = arith.mulf %90, %94 : vector<8x8x8xf32>
    %c0_29 = arith.constant 0 : index
    %c0_30 = arith.constant 0 : index
    %c0_31 = arith.constant 0 : index
    %c0_32 = arith.constant 0 : index
    %96 = vector.load %arg21[%c0_29, %c0_30, %c0_31, %c0_32] : memref<2x8x8x8xf32, #tpu.memory_space<vmem>>, vector<1x8x8x8xf32>
    %97 = vector.shape_cast %96 : vector<1x8x8x8xf32> to vector<8x8x8xf32>
    %98 = vector.shape_cast %95 : vector<8x8x8xf32> to vector<1x8x8x8xf32>
    tpu.vector_store %arg21[%c0_29, %c0_30, %c0_31, %c0_32], %98 {strides = array<i32>} : memref<2x8x8x8xf32, #tpu.memory_space<vmem>>, vector<1x8x8x8xf32>,
    "tpu.trace_start"() <{level = 10 : i32, message = "bqk,bkd->bqd"}> : () -> ()
    %cst_33 = arith.constant dense<0.000000e+00> : vector<8x8x8xf32>
    %99 = tpu.matmul %95, %82, %cst_33 {dimension_numbers = #tpu.dot_dimension_numbers<[2], [1], [1], [2], [0, 0, 0, 1, 1, 2], [0], [0]>} : vector<8x8x8xf32>, vector<8x8x8xf32>, vector<8x8x8xf32> -> vector<8x8x8xf32>
    "tpu.trace_stop"() : () -> ()
    %100 = vector.shape_cast %99 : vector<8x8x8xf32> to vector<4x16x8xf32>
    %c0_34 = arith.constant 0 : index
    %c0_35 = arith.constant 0 : index
    %c0_36 = arith.constant 0 : index
    %101 = vector.load %arg8[%c0_34, %c0_35, %c0_36] : memref<2x32x32xf32, #tpu.memory_space<vmem>>, vector<1x32x32xf32>
    %102 = vector.shape_cast %101 : vector<1x32x32xf32> to vector<32x32xf32>
    %103 = vector.shape_cast %102 : vector<32x32xf32> to vector<4x8x32xf32>
    "tpu.trace_start"() <{level = 10 : i32, message = "hnd,hdo->hno"}> : () -> ()
    %cst_37 = arith.constant dense<0.000000e+00> : vector<4x16x32xf32>
    %104 = tpu.matmul %100, %103, %cst_37 {dimension_numbers = #tpu.dot_dimension_numbers<[2], [1], [1], [2], [0, 0, 0, 1, 1, 2], [0], [0]>} : vector<4x16x8xf32>, vector<4x8x32xf32>, vector<4x16x32xf32> -> vector<4x16x32xf32>
    "tpu.trace_stop"() : () -> ()
    %cst_38 = arith.constant dense<0.000000e+00> : vector<16x32xf32>
    %105 = vector.multi_reduction <add>, %104, %cst_38 [0] : vector<4x16x32xf32> to vector<16x32xf32>
    %c0_39 = arith.constant 0 : index
    %c0_40 = arith.constant 0 : index
    %c0_41 = arith.constant 0 : index
    %106 = vector.load %arg9[%c0_39, %c0_40, %c0_41] : memref<2x1x32xf32, #tpu.memory_space<vmem>>, vector<1x1x32xf32>
    %107 = vector.shape_cast %106 : vector<1x1x32xf32> to vector<1x32xf32>
    %108 = vector.broadcast %107 : vector<1x32xf32> to vector<16x32xf32>
    %109 = arith.addf %105, %108 : vector<16x32xf32>
    %110 = arith.addf %34, %109 : vector<16x32xf32>
    %c0_42 = arith.constant 0 : index
    %c0_43 = arith.constant 0 : index
    %c0_44 = arith.constant 0 : index
    %111 = vector.load %arg10[%c0_42, %c0_43, %c0_44] : memref<2x1x32xf32, #tpu.memory_space<vmem>>, vector<1x1x32xf32>
    %112 = vector.shape_cast %111 : vector<1x1x32xf32> to vector<1x32xf32>
    %c0_45 = arith.constant 0 : index
    %c0_46 = arith.constant 0 : index
    %c0_47 = arith.constant 0 : index
    %113 = vector.load %arg11[%c0_45, %c0_46, %c0_47] : memref<2x1x32xf32, #tpu.memory_space<vmem>>, vector<1x1x32xf32>
    %114 = vector.shape_cast %113 : vector<1x1x32xf32> to vector<1x32xf32>
    %cst_48 = arith.constant dense<0.000000e+00> : vector<16xf32>
    %115 = vector.multi_reduction <add>, %110, %cst_48 [1] : vector<16x32xf32> to vector<16xf32>
    %116 = vector.shape_cast %115 : vector<16xf32> to vector<16x1xf32>
    %cst_49 = arith.constant 3.200000e+01 : f32
    %117 = vector.broadcast %cst_49 : f32 to vector<16x1xf32>
    %118 = arith.divf %116, %117 : vector<16x1xf32>
    %119 = vector.broadcast %118 : vector<16x1xf32> to vector<16x32xf32>
    %120 = arith.subf %110, %119 : vector<16x32xf32>
    %121 = arith.mulf %120, %120 : vector<16x32xf32>
    %cst_50 = arith.constant dense<0.000000e+00> : vector<16xf32>
    %122 = vector.multi_reduction <add>, %121, %cst_50 [1] : vector<16x32xf32> to vector<16xf32>
    %123 = vector.shape_cast %122 : vector<16xf32> to vector<16x1xf32>
    %cst_51 = arith.constant 3.200000e+01 : f32
    %124 = vector.broadcast %cst_51 : f32 to vector<16x1xf32>
    %125 = arith.divf %123, %124 : vector<16x1xf32>
    %126 = vector.broadcast %118 : vector<16x1xf32> to vector<16x32xf32>
    %127 = arith.subf %110, %126 : vector<16x32xf32>
    %cst_52 = arith.constant 9.99999996E-13 : f32
    %128 = vector.broadcast %cst_52 : f32 to vector<16x1xf32>
    %129 = arith.addf %125, %128 : vector<16x1xf32>
    %130 = math.rsqrt %129 : vector<16x1xf32>
    %131 = vector.broadcast %130 : vector<16x1xf32> to vector<16x32xf32>
    %132 = arith.mulf %127, %131 : vector<16x32xf32>
    %133 = vector.broadcast %112 : vector<1x32xf32> to vector<16x32xf32>
    %134 = arith.mulf %132, %133 : vector<16x32xf32>
    %135 = vector.broadcast %114 : vector<1x32xf32> to vector<16x32xf32>
    %136 = arith.addf %134, %135 : vector<16x32xf32>
    %c0_53 = arith.constant 0 : index
    %c0_54 = arith.constant 0 : index
    %c0_55 = arith.constant 0 : index
    %137 = vector.load %arg12[%c0_53, %c0_54, %c0_55] : memref<2x32x64xf32, #tpu.memory_space<vmem>>, vector<1x32x64xf32>
    %138 = vector.shape_cast %137 : vector<1x32x64xf32> to vector<32x64xf32>
    %cst_56 = arith.constant dense<0.000000e+00> : vector<16x64xf32>
    %139 = tpu.matmul %136, %138, %cst_56 {dimension_numbers = #tpu.dot_dimension_numbers<[1], [0], [0], [1], [0, 0, 1, 1], [], []>} : vector<16x32xf32>, vector<32x64xf32>, vector<16x64xf32> -> vector<16x64xf32>
    %c0_57 = arith.constant 0 : index
    %c0_58 = arith.constant 0 : index
    %c0_59 = arith.constant 0 : index
    %140 = vector.load %arg13[%c0_57, %c0_58, %c0_59] : memref<2x1x64xf32, #tpu.memory_space<vmem>>, vector<1x1x64xf32>
    %141 = vector.shape_cast %140 : vector<1x1x64xf32> to vector<1x64xf32>
    %142 = vector.broadcast %141 : vector<1x64xf32> to vector<16x64xf32>
    %143 = arith.addf %139, %142 : vector<16x64xf32>
    %cst_60 = arith.constant 5.000000e-01 : f32
    %144 = vector.broadcast %cst_60 : f32 to vector<16x64xf32>
    %145 = arith.mulf %144, %143 : vector<16x64xf32>
    %cst_61 = arith.constant 0.707106769 : f32
    %146 = vector.broadcast %cst_61 : f32 to vector<16x64xf32>
    %147 = arith.mulf %143, %146 : vector<16x64xf32>
    %cst_62 = arith.constant 0.000000e+00 : f32
    %148 = vector.broadcast %cst_62 : f32 to vector<16x64xf32>
    %149 = arith.cmpf oge, %147, %148 : vector<16x64xf32>
    %cst_63 = arith.constant 1.000000e+00 : f32
    %cst_64 = arith.constant -1.000000e+00 : f32
    %150 = vector.broadcast %cst_63 : f32 to vector<16x64xf32>
    %151 = vector.broadcast %cst_64 : f32 to vector<16x64xf32>
    %152 = arith.select %149, %150, %151 : vector<16x64xi1>, vector<16x64xf32>
    %153 = math.absf %147 : vector<16x64xf32>
    %cst_65 = arith.constant 0.327591091 : f32
    %154 = vector.broadcast %cst_65 : f32 to vector<16x64xf32>
    %155 = arith.mulf %154, %153 : vector<16x64xf32>
    %cst_66 = arith.constant 1.000000e+00 : f32
    %156 = vector.broadcast %cst_66 : f32 to vector<16x64xf32>
    %157 = arith.addf %156, %155 : vector<16x64xf32>
    %cst_67 = arith.constant 1.000000e+00 : f32
    %158 = vector.broadcast %cst_67 : f32 to vector<16x64xf32>
    %159 = arith.divf %158, %157 : vector<16x64xf32>
    %cst_68 = arith.constant 1.06140542 : f32
    %160 = vector.broadcast %cst_68 : f32 to vector<16x64xf32>
    %161 = arith.mulf %160, %159 : vector<16x64xf32>
    %cst_69 = arith.constant -1.45315206 : f32
    %162 = vector.broadcast %cst_69 : f32 to vector<16x64xf32>
    %163 = arith.addf %161, %162 : vector<16x64xf32>
    %164 = arith.mulf %163, %159 : vector<16x64xf32>
    %cst_70 = arith.constant 1.42141378 : f32
    %165 = vector.broadcast %cst_70 : f32 to vector<16x64xf32>
    %166 = arith.addf %164, %165 : vector<16x64xf32>
    %167 = arith.mulf %166, %159 : vector<16x64xf32>
    %cst_71 = arith.constant -0.284496725 : f32
    %168 = vector.broadcast %cst_71 : f32 to vector<16x64xf32>
    %169 = arith.addf %167, %168 : vector<16x64xf32>
    %170 = arith.mulf %169, %159 : vector<16x64xf32>
    %cst_72 = arith.constant 0.254829586 : f32
    %171 = vector.broadcast %cst_72 : f32 to vector<16x64xf32>
    %172 = arith.addf %170, %171 : vector<16x64xf32>
    %173 = arith.mulf %172, %159 : vector<16x64xf32>
    %cst_73 = arith.constant 0.000000e+00 : f32
    %174 = vector.broadcast %cst_73 : f32 to vector<16x64xf32>
    %175 = arith.subf %174, %153 : vector<16x64xf32>
    %176 = arith.mulf %175, %153 : vector<16x64xf32>
    %177 = math.exp %176 : vector<16x64xf32>
    %178 = arith.mulf %173, %177 : vector<16x64xf32>
    %cst_74 = arith.constant 1.000000e+00 : f32
    %179 = vector.broadcast %cst_74 : f32 to vector<16x64xf32>
    %180 = arith.subf %179, %178 : vector<16x64xf32>
    %181 = arith.mulf %152, %180 : vector<16x64xf32>
    %cst_75 = arith.constant 1.000000e+00 : f32
    %182 = vector.broadcast %cst_75 : f32 to vector<16x64xf32>
    %183 = arith.addf %182, %181 : vector<16x64xf32>
    %184 = arith.mulf %145, %183 : vector<16x64xf32>
    %c0_76 = arith.constant 0 : index
    %c0_77 = arith.constant 0 : index
    %c0_78 = arith.constant 0 : index
    %185 = vector.load %arg14[%c0_76, %c0_77, %c0_78] : memref<2x64x32xf32, #tpu.memory_space<vmem>>, vector<1x64x32xf32>
    %186 = vector.shape_cast %185 : vector<1x64x32xf32> to vector<64x32xf32>
    %cst_79 = arith.constant dense<0.000000e+00> : vector<16x32xf32>
    %187 = tpu.matmul %184, %186, %cst_79 {dimension_numbers = #tpu.dot_dimension_numbers<[1], [0], [0], [1], [0, 0, 1, 1], [], []>} : vector<16x64xf32>, vector<64x32xf32>, vector<16x32xf32> -> vector<16x32xf32>
    %c0_80 = arith.constant 0 : index
    %c0_81 = arith.constant 0 : index
    %c0_82 = arith.constant 0 : index
    %188 = vector.load %arg15[%c0_80, %c0_81, %c0_82] : memref<2x1x32xf32, #tpu.memory_space<vmem>>, vector<1x1x32xf32>
    %189 = vector.shape_cast %188 : vector<1x1x32xf32> to vector<1x32xf32>
    %190 = vector.broadcast %189 : vector<1x32xf32> to vector<16x32xf32>
    %191 = arith.addf %187, %190 : vector<16x32xf32>
    %192 = arith.addf %136, %191 : vector<16x32xf32>
    %c0_83 = arith.constant 0 : index
    %c0_84 = arith.constant 0 : index
    %c0_85 = arith.constant 0 : index
    %193 = vector.load %arg16[%c0_83, %c0_84, %c0_85] : memref<2x1x32xf32, #tpu.memory_space<vmem>>, vector<1x1x32xf32>
    %194 = vector.shape_cast %193 : vector<1x1x32xf32> to vector<1x32xf32>
    %c0_86 = arith.constant 0 : index
    %c0_87 = arith.constant 0 : index
    %c0_88 = arith.constant 0 : index
    %195 = vector.load %arg17[%c0_86, %c0_87, %c0_88] : memref<2x1x32xf32, #tpu.memory_space<vmem>>, vector<1x1x32xf32>
    %196 = vector.shape_cast %195 : vector<1x1x32xf32> to vector<1x32xf32>
    %cst_89 = arith.constant dense<0.000000e+00> : vector<16xf32>
    %197 = vector.multi_reduction <add>, %192, %cst_89 [1] : vector<16x32xf32> to vector<16xf32>
    %198 = vector.shape_cast %197 : vector<16xf32> to vector<16x1xf32>
    %cst_90 = arith.constant 3.200000e+01 : f32
    %199 = vector.broadcast %cst_90 : f32 to vector<16x1xf32>
    %200 = arith.divf %198, %199 : vector<16x1xf32>
    %201 = vector.broadcast %200 : vector<16x1xf32> to vector<16x32xf32>
    %202 = arith.subf %192, %201 : vector<16x32xf32>
    %203 = arith.mulf %202, %202 : vector<16x32xf32>
    %cst_91 = arith.constant dense<0.000000e+00> : vector<16xf32>
    %204 = vector.multi_reduction <add>, %203, %cst_91 [1] : vector<16x32xf32> to vector<16xf32>
    %205 = vector.shape_cast %204 : vector<16xf32> to vector<16x1xf32>
    %cst_92 = arith.constant 3.200000e+01 : f32
    %206 = vector.broadcast %cst_92 : f32 to vector<16x1xf32>
    %207 = arith.divf %205, %206 : vector<16x1xf32>
    %208 = vector.broadcast %200 : vector<16x1xf32> to vector<16x32xf32>
    %209 = arith.subf %192, %208 : vector<16x32xf32>
    %cst_93 = arith.constant 9.99999996E-13 : f32
    %210 = vector.broadcast %cst_93 : f32 to vector<16x1xf32>
    %211 = arith.addf %207, %210 : vector<16x1xf32>
    %212 = math.rsqrt %211 : vector<16x1xf32>
    %213 = vector.broadcast %212 : vector<16x1xf32> to vector<16x32xf32>
    %214 = arith.mulf %209, %213 : vector<16x32xf32>
    %215 = vector.broadcast %194 : vector<1x32xf32> to vector<16x32xf32>
    %216 = arith.mulf %214, %215 : vector<16x32xf32>
    %217 = vector.broadcast %196 : vector<1x32xf32> to vector<16x32xf32>
    %218 = arith.addf %216, %217 : vector<16x32xf32>
    %c1 = arith.constant 1 : index
    %c0_94 = arith.constant 0 : index
    %c0_95 = arith.constant 0 : index
    %219 = vector.load %arg6[%c1, %c0_94, %c0_95] : memref<2x32x96xf32, #tpu.memory_space<vmem>>, vector<1x32x96xf32>
    %220 = vector.shape_cast %219 : vector<1x32x96xf32> to vector<32x96xf32>
    %cst_96 = arith.constant dense<0.000000e+00> : vector<16x96xf32>
    %221 = tpu.matmul %218, %220, %cst_96 {dimension_numbers = #tpu.dot_dimension_numbers<[1], [0], [0], [1], [0, 0, 1, 1], [], []>} : vector<16x32xf32>, vector<32x96xf32>, vector<16x96xf32> -> vector<16x96xf32>
    %c1_97 = arith.constant 1 : index
    %c0_98 = arith.constant 0 : index
    %c0_99 = arith.constant 0 : index
    %222 = vector.load %arg7[%c1_97, %c0_98, %c0_99] : memref<2x1x96xf32, #tpu.memory_space<vmem>>, vector<1x1x96xf32>
    %223 = vector.shape_cast %222 : vector<1x1x96xf32> to vector<1x96xf32>
    %224 = vector.broadcast %223 : vector<1x96xf32> to vector<16x96xf32>
    %225 = arith.addf %221, %224 : vector<16x96xf32>
    %226 = vector.extract_strided_slice %225 {offsets = [0, 0], sizes = [16, 8], strides = [1, 1]} : vector<16x96xf32> to vector<16x8xf32>
    %227 = vector.extract_strided_slice %225 {offsets = [0, 8], sizes = [16, 8], strides = [1, 1]} : vector<16x96xf32> to vector<16x8xf32>
    %228 = vector.extract_strided_slice %225 {offsets = [0, 16], sizes = [16, 8], strides = [1, 1]} : vector<16x96xf32> to vector<16x8xf32>
    %229 = vector.extract_strided_slice %225 {offsets = [0, 24], sizes = [16, 8], strides = [1, 1]} : vector<16x96xf32> to vector<16x8xf32>
    %230 = vector.shape_cast %226 : vector<16x8xf32> to vector<1x16x8xf32>
    %231 = vector.shape_cast %227 : vector<16x8xf32> to vector<1x16x8xf32>
    %232 = vector.shape_cast %228 : vector<16x8xf32> to vector<1x16x8xf32>
    %233 = vector.shape_cast %229 : vector<16x8xf32> to vector<1x16x8xf32>
    %234 = tpu.concatenate %230, %231, %232, %233 in 0 : vector<1x16x8xf32>, vector<1x16x8xf32>, vector<1x16x8xf32>, vector<1x16x8xf32> -> vector<4x16x8xf32>
    %235 = vector.shape_cast %234 : vector<4x16x8xf32> to vector<8x8x8xf32>
    %cst_100 = arith.constant 0.353553385 : f32
    %236 = vector.broadcast %cst_100 : f32 to vector<8x8x8xf32>
    %237 = arith.mulf %235, %236 : vector<8x8x8xf32>
    %238 = vector.extract_strided_slice %225 {offsets = [0, 32], sizes = [16, 8], strides = [1, 1]} : vector<16x96xf32> to vector<16x8xf32>
    %239 = vector.extract_strided_slice %225 {offsets = [0, 40], sizes = [16, 8], strides = [1, 1]} : vector<16x96xf32> to vector<16x8xf32>
    %240 = vector.extract_strided_slice %225 {offsets = [0, 48], sizes = [16, 8], strides = [1, 1]} : vector<16x96xf32> to vector<16x8xf32>
    %241 = vector.extract_strided_slice %225 {offsets = [0, 56], sizes = [16, 8], strides = [1, 1]} : vector<16x96xf32> to vector<16x8xf32>
    %242 = vector.shape_cast %238 : vector<16x8xf32> to vector<1x16x8xf32>
    %243 = vector.shape_cast %239 : vector<16x8xf32> to vector<1x16x8xf32>
    %244 = vector.shape_cast %240 : vector<16x8xf32> to vector<1x16x8xf32>
    %245 = vector.shape_cast %241 : vector<16x8xf32> to vector<1x16x8xf32>
    %246 = tpu.concatenate %242, %243, %244, %245 in 0 : vector<1x16x8xf32>, vector<1x16x8xf32>, vector<1x16x8xf32>, vector<1x16x8xf32> -> vector<4x16x8xf32>
    %247 = vector.shape_cast %246 : vector<4x16x8xf32> to vector<8x8x8xf32>
    %248 = vector.extract_strided_slice %225 {offsets = [0, 64], sizes = [16, 8], strides = [1, 1]} : vector<16x96xf32> to vector<16x8xf32>
    %249 = vector.extract_strided_slice %225 {offsets = [0, 72], sizes = [16, 8], strides = [1, 1]} : vector<16x96xf32> to vector<16x8xf32>
    %250 = vector.extract_strided_slice %225 {offsets = [0, 80], sizes = [16, 8], strides = [1, 1]} : vector<16x96xf32> to vector<16x8xf32>
    %251 = vector.extract_strided_slice %225 {offsets = [0, 88], sizes = [16, 8], strides = [1, 1]} : vector<16x96xf32> to vector<16x8xf32>
    %252 = vector.shape_cast %248 : vector<16x8xf32> to vector<1x16x8xf32>
    %253 = vector.shape_cast %249 : vector<16x8xf32> to vector<1x16x8xf32>
    %254 = vector.shape_cast %250 : vector<16x8xf32> to vector<1x16x8xf32>
    %255 = vector.shape_cast %251 : vector<16x8xf32> to vector<1x16x8xf32>
    %256 = tpu.concatenate %252, %253, %254, %255 in 0 : vector<1x16x8xf32>, vector<1x16x8xf32>, vector<1x16x8xf32>, vector<1x16x8xf32> -> vector<4x16x8xf32>
    %257 = vector.shape_cast %256 : vector<4x16x8xf32> to vector<8x8x8xf32>
    "tpu.trace_start"() <{level = 10 : i32, message = "bqd,bkd->bqk"}> : () -> ()
    %cst_101 = arith.constant dense<0.000000e+00> : vector<8x8x8xf32>
    %258 = tpu.matmul %237, %247, %cst_101 {dimension_numbers = #tpu.dot_dimension_numbers<[2], [2], [1], [1], [0, 0, 0, 1, 1, 1], [0], [0]>} : vector<8x8x8xf32>, vector<8x8x8xf32>, vector<8x8x8xf32> -> vector<8x8x8xf32>
    "tpu.trace_stop"() : () -> ()
    %259 = vector.broadcast %43 : vector<8x1x8xf32> to vector<8x8x8xf32>
    %260 = arith.addf %258, %259 : vector<8x8x8xf32>
    %cst_102 = arith.constant dense<0xFF800000> : vector<8x8xf32>
    %261 = vector.multi_reduction <maximumf>, %260, %cst_102 [2] : vector<8x8x8xf32> to vector<8x8xf32>
    %262 = vector.shape_cast %261 : vector<8x8xf32> to vector<8x8x1xf32>
    %263 = vector.broadcast %262 : vector<8x8x1xf32> to vector<8x8x8xf32>
    %264 = arith.subf %260, %263 : vector<8x8x8xf32>
    %265 = math.exp %264 : vector<8x8x8xf32>
    %cst_103 = arith.constant dense<0.000000e+00> : vector<8x8xf32>
    %266 = vector.multi_reduction <add>, %265, %cst_103 [2] : vector<8x8x8xf32> to vector<8x8xf32>
    %267 = vector.shape_cast %266 : vector<8x8xf32> to vector<8x8x1xf32>
    %268 = tpu.reciprocal %267 {approx = true} : vector<8x8x1xf32> -> vector<8x8x1xf32>
    %269 = vector.broadcast %268 : vector<8x8x1xf32> to vector<8x8x8xf32>
    %270 = arith.mulf %265, %269 : vector<8x8x8xf32>
    %c1_104 = arith.constant 1 : index
    %c0_105 = arith.constant 0 : index
    %c0_106 = arith.constant 0 : index
    %c0_107 = arith.constant 0 : index
    %271 = vector.load %arg21[%c1_104, %c0_105, %c0_106, %c0_107] : memref<2x8x8x8xf32, #tpu.memory_space<vmem>>, vector<1x8x8x8xf32>
    %272 = vector.shape_cast %271 : vector<1x8x8x8xf32> to vector<8x8x8xf32>
    %273 = vector.shape_cast %270 : vector<8x8x8xf32> to vector<1x8x8x8xf32>
    tpu.vector_store %arg21[%c1_104, %c0_105, %c0_106, %c0_107], %273 {strides = array<i32>} : memref<2x8x8x8xf32, #tpu.memory_space<vmem>>, vector<1x8x8x8xf32>,
    "tpu.trace_start"() <{level = 10 : i32, message = "bqk,bkd->bqd"}> : () -> ()
    %cst_108 = arith.constant dense<0.000000e+00> : vector<8x8x8xf32>
    %274 = tpu.matmul %270, %257, %cst_108 {dimension_numbers = #tpu.dot_dimension_numbers<[2], [1], [1], [2], [0, 0, 0, 1, 1, 2], [0], [0]>} : vector<8x8x8xf32>, vector<8x8x8xf32>, vector<8x8x8xf32> -> vector<8x8x8xf32>
    "tpu.trace_stop"() : () -> ()
    %275 = vector.shape_cast %274 : vector<8x8x8xf32> to vector<4x16x8xf32>
    %c1_109 = arith.constant 1 : index
    %c0_110 = arith.constant 0 : index
    %c0_111 = arith.constant 0 : index
    %276 = vector.load %arg8[%c1_109, %c0_110, %c0_111] : memref<2x32x32xf32, #tpu.memory_space<vmem>>, vector<1x32x32xf32>
    %277 = vector.shape_cast %276 : vector<1x32x32xf32> to vector<32x32xf32>
    %278 = vector.shape_cast %277 : vector<32x32xf32> to vector<4x8x32xf32>
    "tpu.trace_start"() <{level = 10 : i32, message = "hnd,hdo->hno"}> : () -> ()
    %cst_112 = arith.constant dense<0.000000e+00> : vector<4x16x32xf32>
    %279 = tpu.matmul %275, %278, %cst_112 {dimension_numbers = #tpu.dot_dimension_numbers<[2], [1], [1], [2], [0, 0, 0, 1, 1, 2], [0], [0]>} : vector<4x16x8xf32>, vector<4x8x32xf32>, vector<4x16x32xf32> -> vector<4x16x32xf32>
    "tpu.trace_stop"() : () -> ()
    %cst_113 = arith.constant dense<0.000000e+00> : vector<16x32xf32>
    %280 = vector.multi_reduction <add>, %279, %cst_113 [0] : vector<4x16x32xf32> to vector<16x32xf32>
    %c1_114 = arith.constant 1 : index
    %c0_115 = arith.constant 0 : index
    %c0_116 = arith.constant 0 : index
    %281 = vector.load %arg9[%c1_114, %c0_115, %c0_116] : memref<2x1x32xf32, #tpu.memory_space<vmem>>, vector<1x1x32xf32>
    %282 = vector.shape_cast %281 : vector<1x1x32xf32> to vector<1x32xf32>
    %283 = vector.broadcast %282 : vector<1x32xf32> to vector<16x32xf32>
    %284 = arith.addf %280, %283 : vector<16x32xf32>
    %285 = arith.addf %218, %284 : vector<16x32xf32>
    %c1_117 = arith.constant 1 : index
    %c0_118 = arith.constant 0 : index
    %c0_119 = arith.constant 0 : index
    %286 = vector.load %arg10[%c1_117, %c0_118, %c0_119] : memref<2x1x32xf32, #tpu.memory_space<vmem>>, vector<1x1x32xf32>
    %287 = vector.shape_cast %286 : vector<1x1x32xf32> to vector<1x32xf32>
    %c1_120 = arith.constant 1 : index
    %c0_121 = arith.constant 0 : index
    %c0_122 = arith.constant 0 : index
    %288 = vector.load %arg11[%c1_120, %c0_121, %c0_122] : memref<2x1x32xf32, #tpu.memory_space<vmem>>, vector<1x1x32xf32>
    %289 = vector.shape_cast %288 : vector<1x1x32xf32> to vector<1x32xf32>
    %cst_123 = arith.constant dense<0.000000e+00> : vector<16xf32>
    %290 = vector.multi_reduction <add>, %285, %cst_123 [1] : vector<16x32xf32> to vector<16xf32>
    %291 = vector.shape_cast %290 : vector<16xf32> to vector<16x1xf32>
    %cst_124 = arith.constant 3.200000e+01 : f32
    %292 = vector.broadcast %cst_124 : f32 to vector<16x1xf32>
    %293 = arith.divf %291, %292 : vector<16x1xf32>
    %294 = vector.broadcast %293 : vector<16x1xf32> to vector<16x32xf32>
    %295 = arith.subf %285, %294 : vector<16x32xf32>
    %296 = arith.mulf %295, %295 : vector<16x32xf32>
    %cst_125 = arith.constant dense<0.000000e+00> : vector<16xf32>
    %297 = vector.multi_reduction <add>, %296, %cst_125 [1] : vector<16x32xf32> to vector<16xf32>
    %298 = vector.shape_cast %297 : vector<16xf32> to vector<16x1xf32>
    %cst_126 = arith.constant 3.200000e+01 : f32
    %299 = vector.broadcast %cst_126 : f32 to vector<16x1xf32>
    %300 = arith.divf %298, %299 : vector<16x1xf32>
    %301 = vector.broadcast %293 : vector<16x1xf32> to vector<16x32xf32>
    %302 = arith.subf %285, %301 : vector<16x32xf32>
    %cst_127 = arith.constant 9.99999996E-13 : f32
    %303 = vector.broadcast %cst_127 : f32 to vector<16x1xf32>
    %304 = arith.addf %300, %303 : vector<16x1xf32>
    %305 = math.rsqrt %304 : vector<16x1xf32>
    %306 = vector.broadcast %305 : vector<16x1xf32> to vector<16x32xf32>
    %307 = arith.mulf %302, %306 : vector<16x32xf32>
    %308 = vector.broadcast %287 : vector<1x32xf32> to vector<16x32xf32>
    %309 = arith.mulf %307, %308 : vector<16x32xf32>
    %310 = vector.broadcast %289 : vector<1x32xf32> to vector<16x32xf32>
    %311 = arith.addf %309, %310 : vector<16x32xf32>
    %c1_128 = arith.constant 1 : index
    %c0_129 = arith.constant 0 : index
    %c0_130 = arith.constant 0 : index
    %312 = vector.load %arg12[%c1_128, %c0_129, %c0_130] : memref<2x32x64xf32, #tpu.memory_space<vmem>>, vector<1x32x64xf32>
    %313 = vector.shape_cast %312 : vector<1x32x64xf32> to vector<32x64xf32>
    %cst_131 = arith.constant dense<0.000000e+00> : vector<16x64xf32>
    %314 = tpu.matmul %311, %313, %cst_131 {dimension_numbers = #tpu.dot_dimension_numbers<[1], [0], [0], [1], [0, 0, 1, 1], [], []>} : vector<16x32xf32>, vector<32x64xf32>, vector<16x64xf32> -> vector<16x64xf32>
    %c1_132 = arith.constant 1 : index
    %c0_133 = arith.constant 0 : index
    %c0_134 = arith.constant 0 : index
    %315 = vector.load %arg13[%c1_132, %c0_133, %c0_134] : memref<2x1x64xf32, #tpu.memory_space<vmem>>, vector<1x1x64xf32>
    %316 = vector.shape_cast %315 : vector<1x1x64xf32> to vector<1x64xf32>
    %317 = vector.broadcast %316 : vector<1x64xf32> to vector<16x64xf32>
    %318 = arith.addf %314, %317 : vector<16x64xf32>
    %cst_135 = arith.constant 5.000000e-01 : f32
    %319 = vector.broadcast %cst_135 : f32 to vector<16x64xf32>
    %320 = arith.mulf %319, %318 : vector<16x64xf32>
    %cst_136 = arith.constant 0.707106769 : f32
    %321 = vector.broadcast %cst_136 : f32 to vector<16x64xf32>
    %322 = arith.mulf %318, %321 : vector<16x64xf32>
    %cst_137 = arith.constant 0.000000e+00 : f32
    %323 = vector.broadcast %cst_137 : f32 to vector<16x64xf32>
    %324 = arith.cmpf oge, %322, %323 : vector<16x64xf32>
    %cst_138 = arith.constant 1.000000e+00 : f32
    %cst_139 = arith.constant -1.000000e+00 : f32
    %325 = vector.broadcast %cst_138 : f32 to vector<16x64xf32>
    %326 = vector.broadcast %cst_139 : f32 to vector<16x64xf32>
    %327 = arith.select %324, %325, %326 : vector<16x64xi1>, vector<16x64xf32>
    %328 = math.absf %322 : vector<16x64xf32>
    %cst_140 = arith.constant 0.327591091 : f32
    %329 = vector.broadcast %cst_140 : f32 to vector<16x64xf32>
    %330 = arith.mulf %329, %328 : vector<16x64xf32>
    %cst_141 = arith.constant 1.000000e+00 : f32
    %331 = vector.broadcast %cst_141 : f32 to vector<16x64xf32>
    %332 = arith.addf %331, %330 : vector<16x64xf32>
    %cst_142 = arith.constant 1.000000e+00 : f32
    %333 = vector.broadcast %cst_142 : f32 to vector<16x64xf32>
    %334 = arith.divf %333, %332 : vector<16x64xf32>
    %cst_143 = arith.constant 1.06140542 : f32
    %335 = vector.broadcast %cst_143 : f32 to vector<16x64xf32>
    %336 = arith.mulf %335, %334 : vector<16x64xf32>
    %cst_144 = arith.constant -1.45315206 : f32
    %337 = vector.broadcast %cst_144 : f32 to vector<16x64xf32>
    %338 = arith.addf %336, %337 : vector<16x64xf32>
    %339 = arith.mulf %338, %334 : vector<16x64xf32>
    %cst_145 = arith.constant 1.42141378 : f32
    %340 = vector.broadcast %cst_145 : f32 to vector<16x64xf32>
    %341 = arith.addf %339, %340 : vector<16x64xf32>
    %342 = arith.mulf %341, %334 : vector<16x64xf32>
    %cst_146 = arith.constant -0.284496725 : f32
    %343 = vector.broadcast %cst_146 : f32 to vector<16x64xf32>
    %344 = arith.addf %342, %343 : vector<16x64xf32>
    %345 = arith.mulf %344, %334 : vector<16x64xf32>
    %cst_147 = arith.constant 0.254829586 : f32
    %346 = vector.broadcast %cst_147 : f32 to vector<16x64xf32>
    %347 = arith.addf %345, %346 : vector<16x64xf32>
    %348 = arith.mulf %347, %334 : vector<16x64xf32>
    %cst_148 = arith.constant 0.000000e+00 : f32
    %349 = vector.broadcast %cst_148 : f32 to vector<16x64xf32>
    %350 = arith.subf %349, %328 : vector<16x64xf32>
    %351 = arith.mulf %350, %328 : vector<16x64xf32>
    %352 = math.exp %351 : vector<16x64xf32>
    %353 = arith.mulf %348, %352 : vector<16x64xf32>
    %cst_149 = arith.constant 1.000000e+00 : f32
    %354 = vector.broadcast %cst_149 : f32 to vector<16x64xf32>
    %355 = arith.subf %354, %353 : vector<16x64xf32>
    %356 = arith.mulf %327, %355 : vector<16x64xf32>
    %cst_150 = arith.constant 1.000000e+00 : f32
    %357 = vector.broadcast %cst_150 : f32 to vector<16x64xf32>
    %358 = arith.addf %357, %356 : vector<16x64xf32>
    %359 = arith.mulf %320, %358 : vector<16x64xf32>
    %c1_151 = arith.constant 1 : index
    %c0_152 = arith.constant 0 : index
    %c0_153 = arith.constant 0 : index
    %360 = vector.load %arg14[%c1_151, %c0_152, %c0_153] : memref<2x64x32xf32, #tpu.memory_space<vmem>>, vector<1x64x32xf32>
    %361 = vector.shape_cast %360 : vector<1x64x32xf32> to vector<64x32xf32>
    %cst_154 = arith.constant dense<0.000000e+00> : vector<16x32xf32>
    %362 = tpu.matmul %359, %361, %cst_154 {dimension_numbers = #tpu.dot_dimension_numbers<[1], [0], [0], [1], [0, 0, 1, 1], [], []>} : vector<16x64xf32>, vector<64x32xf32>, vector<16x32xf32> -> vector<16x32xf32>
    %c1_155 = arith.constant 1 : index
    %c0_156 = arith.constant 0 : index
    %c0_157 = arith.constant 0 : index
    %363 = vector.load %arg15[%c1_155, %c0_156, %c0_157] : memref<2x1x32xf32, #tpu.memory_space<vmem>>, vector<1x1x32xf32>
    %364 = vector.shape_cast %363 : vector<1x1x32xf32> to vector<1x32xf32>
    %365 = vector.broadcast %364 : vector<1x32xf32> to vector<16x32xf32>
    %366 = arith.addf %362, %365 : vector<16x32xf32>
    %367 = arith.addf %311, %366 : vector<16x32xf32>
    %c1_158 = arith.constant 1 : index
    %c0_159 = arith.constant 0 : index
    %c0_160 = arith.constant 0 : index
    %368 = vector.load %arg16[%c1_158, %c0_159, %c0_160] : memref<2x1x32xf32, #tpu.memory_space<vmem>>, vector<1x1x32xf32>
    %369 = vector.shape_cast %368 : vector<1x1x32xf32> to vector<1x32xf32>
    %c1_161 = arith.constant 1 : index
    %c0_162 = arith.constant 0 : index
    %c0_163 = arith.constant 0 : index
    %370 = vector.load %arg17[%c1_161, %c0_162, %c0_163] : memref<2x1x32xf32, #tpu.memory_space<vmem>>, vector<1x1x32xf32>
    %371 = vector.shape_cast %370 : vector<1x1x32xf32> to vector<1x32xf32>
    %cst_164 = arith.constant dense<0.000000e+00> : vector<16xf32>
    %372 = vector.multi_reduction <add>, %367, %cst_164 [1] : vector<16x32xf32> to vector<16xf32>
    %373 = vector.shape_cast %372 : vector<16xf32> to vector<16x1xf32>
    %cst_165 = arith.constant 3.200000e+01 : f32
    %374 = vector.broadcast %cst_165 : f32 to vector<16x1xf32>
    %375 = arith.divf %373, %374 : vector<16x1xf32>
    %376 = vector.broadcast %375 : vector<16x1xf32> to vector<16x32xf32>
    %377 = arith.subf %367, %376 : vector<16x32xf32>
    %378 = arith.mulf %377, %377 : vector<16x32xf32>
    %cst_166 = arith.constant dense<0.000000e+00> : vector<16xf32>
    %379 = vector.multi_reduction <add>, %378, %cst_166 [1] : vector<16x32xf32> to vector<16xf32>
    %380 = vector.shape_cast %379 : vector<16xf32> to vector<16x1xf32>
    %cst_167 = arith.constant 3.200000e+01 : f32
    %381 = vector.broadcast %cst_167 : f32 to vector<16x1xf32>
    %382 = arith.divf %380, %381 : vector<16x1xf32>
    %383 = vector.broadcast %375 : vector<16x1xf32> to vector<16x32xf32>
    %384 = arith.subf %367, %383 : vector<16x32xf32>
    %cst_168 = arith.constant 9.99999996E-13 : f32
    %385 = vector.broadcast %cst_168 : f32 to vector<16x1xf32>
    %386 = arith.addf %382, %385 : vector<16x1xf32>
    %387 = math.rsqrt %386 : vector<16x1xf32>
    %388 = vector.broadcast %387 : vector<16x1xf32> to vector<16x32xf32>
    %389 = arith.mulf %384, %388 : vector<16x32xf32>
    %390 = vector.broadcast %369 : vector<1x32xf32> to vector<16x32xf32>
    %391 = arith.mulf %389, %390 : vector<16x32xf32>
    %392 = vector.broadcast %371 : vector<1x32xf32> to vector<16x32xf32>
    %393 = arith.addf %391, %392 : vector<16x32xf32>
    %c0_169 = arith.constant 0 : index
    %c0_170 = arith.constant 0 : index
    %394 = vector.load %arg18[%c0_169, %c0_170] : memref<1x32xf32, #tpu.memory_space<vmem>>, vector<1x32xf32>
    %c0_171 = arith.constant 0 : index
    %c0_172 = arith.constant 0 : index
    %395 = vector.load %arg19[%c0_171, %c0_172] : memref<1x32xf32, #tpu.memory_space<vmem>>, vector<1x32xf32>
    %cst_173 = arith.constant dense<0.000000e+00> : vector<16xf32>
    %396 = vector.multi_reduction <add>, %393, %cst_173 [1] : vector<16x32xf32> to vector<16xf32>
    %397 = vector.shape_cast %396 : vector<16xf32> to vector<16x1xf32>
    %cst_174 = arith.constant 3.200000e+01 : f32
    %398 = vector.broadcast %cst_174 : f32 to vector<16x1xf32>
    %399 = arith.divf %397, %398 : vector<16x1xf32>
    %400 = vector.broadcast %399 : vector<16x1xf32> to vector<16x32xf32>
    %401 = arith.subf %393, %400 : vector<16x32xf32>
    %402 = arith.mulf %401, %401 : vector<16x32xf32>
    %cst_175 = arith.constant dense<0.000000e+00> : vector<16xf32>
    %403 = vector.multi_reduction <add>, %402, %cst_175 [1] : vector<16x32xf32> to vector<16xf32>
    %404 = vector.shape_cast %403 : vector<16xf32> to vector<16x1xf32>
    %cst_176 = arith.constant 3.200000e+01 : f32
    %405 = vector.broadcast %cst_176 : f32 to vector<16x1xf32>
    %406 = arith.divf %404, %405 : vector<16x1xf32>
    %407 = vector.broadcast %399 : vector<16x1xf32> to vector<16x32xf32>
    %408 = arith.subf %393, %407 : vector<16x32xf32>
    %cst_177 = arith.constant 9.99999996E-13 : f32
    %409 = vector.broadcast %cst_177 : f32 to vector<16x1xf32>
    %410 = arith.addf %406, %409 : vector<16x1xf32>
    %411 = math.rsqrt %410 : vector<16x1xf32>
    %412 = vector.broadcast %411 : vector<16x1xf32> to vector<16x32xf32>
    %413 = arith.mulf %408, %412 : vector<16x32xf32>
    %414 = vector.broadcast %394 : vector<1x32xf32> to vector<16x32xf32>
    %415 = arith.mulf %413, %414 : vector<16x32xf32>
    %416 = vector.broadcast %395 : vector<1x32xf32> to vector<16x32xf32>
    %417 = arith.addf %415, %416 : vector<16x32xf32>
    %c0_178 = arith.constant 0 : index
    %c0_179 = arith.constant 0 : index
    %418 = vector.load %arg20[%c0_178, %c0_179] : memref<16x32xf32, #tpu.memory_space<vmem>>, vector<16x32xf32>
    tpu.vector_store %arg20[%c0_178, %c0_179], %417 {strides = array<i32>} : memref<16x32xf32, #tpu.memory_space<vmem>>, vector<16x32xf32>,
    return
  }
}

</mosaic_0001>

<bundles_post_ra>
// kernel: transformer_forward.1
= control target key start
LH: loop header
LB: loop body
LE: loop exit
PB: predicated region body
PF: predicated region fallthrough
CT: control target
= control target key end

     0   :  { %s6501_s0 = inlined_call_operand.vmem [shape: s32[16,1], index: 0, kind: input, shape index: {}]   ;;  %s6502_s1 = inlined_call_operand.vmem [shape: f32[2,8], index: 1, kind: input, shape index: {}]   ;;  %s6503_s2 = inlined_call_operand.vmem [shape: f32[32,32], index: 2, kind: input, shape index: {}]   ;;  %s6504_s3 = inlined_call_operand.hbm [shape: f32[16,32], index: 3, kind: input, shape index: {}]   ;;  %s6505_s4 = inlined_call_operand.hbm [shape: f32[1,32], index: 4, kind: input, shape index: {}]   ;;  %s6506_s5 = inlined_call_operand.hbm [shape: f32[1,32], index: 5, kind: input, shape index: {}]   ;;  %s6507_s6 = inlined_call_operand.vmem [shape: f32[2,32,96], index: 6, kind: input, shape index: {}]   ;;  %s6508_s7 = inlined_call_operand.hbm [shape: f32[2,1,96], index: 7, kind: input, shape index: {}]   ;;  %s6509_s8 = inlined_call_operand.vmem [shape: f32[2,32,32], index: 8, kind: input, shape index: {}]   ;;  %s6510_s9 = inlined_call_operand.hbm [shape: f32[2,1,32], index: 9, kind: input, shape index: {}]   ;;  %s6511_s10 = inlined_call_operand.vmem [shape: f32[2,1,32], index: 10, kind: input, shape index: {}]   ;;  %s6512_s11 = inlined_call_operand.vmem [shape: f32[2,1,32], index: 11, kind: input, shape index: {}]   ;;  %s6513_s12 = inlined_call_operand.vmem [shape: f32[2,32,64], index: 12, kind: input, shape index: {}]   ;;  %s6514_s13 = inlined_call_operand.hbm [shape: f32[2,1,64], index: 13, kind: input, shape index: {}]   ;;  %s6515_s14 = inlined_call_operand.vmem [shape: f32[2,64,32], index: 14, kind: input, shape index: {}]   ;;  %s6516_s15 = inlined_call_operand.hbm [shape: f32[2,1,32], index: 15, kind: input, shape index: {}]   ;;  %s6517_s16 = inlined_call_operand.vmem [shape: f32[2,1,32], index: 16, kind: input, shape index: {}]   ;;  %s6518_s17 = inlined_call_operand.vmem [shape: f32[2,1,32], index: 17, kind: input, shape index: {}]   ;;  %s6519_s18 = inlined_call_operand.hbm [shape: f32[1,32], index: 18, kind: input, shape index: {}]   ;;  %s6520_s19 = inlined_call_operand.hbm [shape: f32[1,32], index: 19, kind: input, shape index: {}]   ;;  %s6521_s20 = inlined_call_operand.hbm [shape: f32[16,32], index: 20, kind: output, shape index: {0}]   ;;  %s6522_s21 = inlined_call_operand.vmem [shape: f32[2,8,8,8], index: 21, kind: output, shape index: {1}]  }
   0x1   :  { %6525 = sst [smem:[#allocation24_spill]] %s6501_s0 }
   0x2   :  { %6526 = sst [smem:[#allocation25_spill]] %s6502_s1 }
   0x3   :  { %6527 = sst [smem:[#allocation26_spill]] %s6503_s2 }
   0x4   :  { %6528 = sst [smem:[#allocation27_spill]] %s6504_s3 }
   0x5   :  { %6529 = sst [smem:[#allocation28_spill]] %s6505_s4 }
   0x6   :  { %6530 = sst [smem:[#allocation29_spill]] %s6506_s5 }
   0x7   :  { %27 = vsyncpa [#allocation3], 0 }
   0x8   :  { %28 = vsyncpa [#allocation6], 0 }
   0x9   :  { %29 = vsyncpa [#allocation9], 0 }
   0xa   :  { %30 = vsyncpa [#allocation12], 0 }
   0xb   :  { %31 = vsyncpa [#allocation15], 0 }
   0xc   :  { %32 = vsyncpa [#allocation4], 0  ;;  %s5606_s2 = smov [#allocation5]   ;;  %s5607_s26 = smov [#allocation8]  }
   0xd   :  { %s57_s25 = sshll.u32 %s5606_s2, 4  ;;  %s78_s27 = sshll.u32 %s5607_s26, 4  ;;  %s58_s25 = int_to_ptr.vmem [resolvable:$true] %s57_s25  ;;  %s79_s27 = int_to_ptr.vmem [resolvable:$true] %s78_s27 }
   0xe   :  { %s5402_s3 = scalar_lea.vmem %s58_s25, 16  ;;  %s5406_s28 = scalar_lea.vmem %s58_s25, 32 }
   0xf   :  { %p5403_p0 = scmp.ne.s32.totalorder %s58_s25, %s5402_s3  ;;  %p5407_p1 = scmp.lt.s32.totalorder %s58_s25, %s58_s25 }
  0x10   :  { %p5408_p2 = scmp.lt.s32.totalorder %s5406_s28, %s5402_s3 }
  0x12   :  { %p5409_p3 = por %p5408_p2, %p5407_p1 }
  0x14   :  { %p5410_p4 = pnand %p5409_p3, %p5403_p0 }
  0x16   :  { %5413 = shalt.err (!%p5410_p4)
}
  0x17   :  { %s6531_s4 = sld [smem:[#allocation28_spill]]  ;;  %s5422_s30 = scalar_lea.vmem %s79_s27, 32 }
  0x18   :  { %p5423_p5 = scmp.ne.s32.totalorder %s79_s27, %s5422_s30  ;;  %p5427_p6 = scmp.lt.s32.totalorder %s79_s27, %s79_s27 }
  0x19   :  { %p5428_p7 = scmp.lt.s32.totalorder %s5422_s30, %s5422_s30 }
  0x1b   :  { %p5429_p8 = por %p5428_p7, %p5427_p6 }
  0x1d   :  { %60 = dma.hbm_to_vmem [thread:$0]  %s6531_s4, 16, %s58_s25, [#allocation6]  }
  0x1e   :  { %p5430_p9 = pnand %p5429_p8, %p5423_p5 }
  0x20   :  { %5433 = shalt.err (!%p5430_p9)
}
  0x21   :  { %s5608_s5 = smov 16   ;;  %s5609_s22 = smov 1  }
  0x22   :  { %84 = dma.hbm_to_vmem [thread:$0]  %s6508_s7, 32, %s79_s27, [#allocation9], %s5608_s5, %s5608_s5, %s5609_s22  }
  0x23   :  { %s5610_s24 = smov [#allocation11]   ;;  %s5611_s26 = smov [#allocation14]  }
  0x24   :  { %s110_s2 = sshll.u32 %s5610_s24, 4  ;;  %s141_s25 = sshll.u32 %s5611_s26, 4  ;;  %s111_s2 = int_to_ptr.vmem [resolvable:$true] %s110_s2  ;;  %s142_s25 = int_to_ptr.vmem [resolvable:$true] %s141_s25 }
  0x25   :  { %s5442_s3 = scalar_lea.vmem %s111_s2, 32  ;;  %p5447_p11 = scmp.lt.s32.totalorder %s111_s2, %s111_s2 }
  0x26   :  { %p5443_p10 = scmp.ne.s32.totalorder %s111_s2, %s5442_s3  ;;  %p5448_p12 = scmp.lt.s32.totalorder %s5442_s3, %s5442_s3 }
  0x28   :  { %p5449_p13 = por %p5448_p12, %p5447_p11 }
  0x2a   :  { %p5450_p0 = pnand %p5449_p13, %p5443_p10 }
  0x2c   :  { %5453 = shalt.err (!%p5450_p0)
}
  0x2d   :  { %116 = dma.hbm_to_vmem [thread:$0]  %s6514_s13, 32, %s111_s2, [#allocation12], %s5608_s5, %s5608_s5, %s5609_s22  }
  0x2e   :  { %s5462_s7 = scalar_lea.vmem %s142_s25, 16  ;;  %s5466_s27 = scalar_lea.vmem %s142_s25, 32 }
  0x2f   :  { %p5463_p1 = scmp.ne.s32.totalorder %s142_s25, %s5462_s7  ;;  %p5467_p2 = scmp.lt.s32.totalorder %s142_s25, %s142_s25 }
  0x30   :  { %p5468_p3 = scmp.lt.s32.totalorder %s5466_s27, %s5462_s7 }
  0x32   :  { %p5469_p4 = por %p5468_p3, %p5467_p2 }
  0x34   :  { %p5470_p5 = pnand %p5469_p4, %p5463_p1 }
  0x36   :  { %5473 = shalt.err (!%p5470_p5)
}
  0x37   :  { %144 = dma.hbm_to_vmem [thread:$0]  %s6519_s18, 16, %s142_s25, [#allocation15]  }
  0x38   :  { %s5612_s30 = smov [#allocation2]  }
  0x39   :  { %s44_s23 = sshll.u32 %s5612_s30, 4  ;;  %s45_s23 = int_to_ptr.vmem [resolvable:$true] %s44_s23 }
  0x3a   :  { %s5482_s1 = scalar_lea.vmem %s45_s23, 256  ;;  %p5487_p7 = scmp.lt.s32.totalorder %s45_s23, %s45_s23 }
  0x3b   :  { %p5483_p6 = scmp.ne.s32.totalorder %s45_s23, %s5482_s1  ;;  %p5488_p8 = scmp.lt.s32.totalorder %s5482_s1, %s5482_s1 }
  0x3d   :  { %p5489_p9 = por %p5488_p8, %p5487_p7 }
  0x3f   :  { %p5490_p10 = pnand %p5489_p9, %p5483_p6 }
  0x41   :  { %5493 = shalt.err (!%p5490_p10)
}
  0x42   :  { %s5613_s13 = smov 128   ;;  %s5614_s24 = smov 8  }
  0x43   :  { %s6532_s3 = sld [smem:[#allocation27_spill]]  ;;  %s5615_s18 = smov [#allocation7]  }
  0x44   :  { %s67_s25 = sshll.u32 %s5615_s18, 4  ;;  %s5616_s28 = smov [#allocation10]   ;;  %s68_s25 = int_to_ptr.vmem [resolvable:$true] %s67_s25 }
  0x45   :  { %s92_s29 = sshll.u32 %s5616_s28, 4  ;;  %s5502_s7 = scalar_lea.vmem %s68_s25, 16  ;;  %s93_s29 = int_to_ptr.vmem [resolvable:$true] %s92_s29 }
  0x46   :  { %p5503_p11 = scmp.ne.s32.totalorder %s68_s25, %s5502_s7  ;;  %s5506_s27 = scalar_lea.vmem %s68_s25, 32 }
  0x47   :  { %p5507_p12 = scmp.lt.s32.totalorder %s68_s25, %s68_s25  ;;  %p5508_p13 = scmp.lt.s32.totalorder %s5506_s27, %s5502_s7 }
  0x49   :  { %50 = dma.hbm_to_vmem [thread:$0]  %s6532_s3, 256, %s45_s23, [#allocation3], %s5613_s13, %s5613_s13, %s5614_s24  }
  0x4a   :  { %p5509_p0 = por %p5508_p13, %p5507_p12 }
  0x4c   :  { %p5510_p1 = pnand %p5509_p0, %p5503_p11 }
  0x4e   :  { %5513 = shalt.err (!%p5510_p1)
}
  0x4f   :  { %s6533_s30 = sld [smem:[#allocation29_spill]]  ;;  %s5522_s1 = scalar_lea.vmem %s93_s29, 32 }
  0x50   :  { %p5523_p2 = scmp.ne.s32.totalorder %s93_s29, %s5522_s1  ;;  %p5527_p3 = scmp.lt.s32.totalorder %s93_s29, %s93_s29 }
  0x51   :  { %p5528_p4 = scmp.lt.s32.totalorder %s5522_s1, %s5522_s1 }
  0x53   :  { %p5529_p5 = por %p5528_p4, %p5527_p3 }
  0x55   :  { %70 = dma.hbm_to_vmem [thread:$0]  %s6533_s30, 16, %s68_s25, [#allocation6]  }
  0x56   :  { %p5530_p6 = pnand %p5529_p5, %p5523_p2 }
  0x58   :  { %5533 = shalt.err (!%p5530_p6)
}
  0x59   :  { %98 = dma.hbm_to_vmem [thread:$0]  %s6510_s9, 32, %s93_s29, [#allocation9], %s5608_s5, %s5608_s5, %s5609_s22  }
  0x5a   :  { %s5617_s26 = smov [#allocation13]   ;;  %s5618_s18 = smov [#allocation16]  }
  0x5b   :  { %s124_s3 = sshll.u32 %s5617_s26, 4  ;;  %s151_s25 = sshll.u32 %s5618_s18, 4  ;;  %s125_s3 = int_to_ptr.vmem [resolvable:$true] %s124_s3  ;;  %s152_s25 = int_to_ptr.vmem [resolvable:$true] %s151_s25 }
  0x5c   :  { %s5542_s28 = scalar_lea.vmem %s125_s3, 32  ;;  %p5547_p8 = scmp.lt.s32.totalorder %s125_s3, %s125_s3 }
  0x5d   :  { %p5543_p7 = scmp.ne.s32.totalorder %s125_s3, %s5542_s28  ;;  %p5548_p9 = scmp.lt.s32.totalorder %s5542_s28, %s5542_s28 }
  0x5f   :  { %p5549_p10 = por %p5548_p9, %p5547_p8 }
  0x61   :  { %p5550_p11 = pnand %p5549_p10, %p5543_p7 }
  0x63   :  { %5553 = shalt.err (!%p5550_p11)
}
  0x64   :  { %130 = dma.hbm_to_vmem [thread:$0]  %s6516_s15, 32, %s125_s3, [#allocation12], %s5608_s5, %s5608_s5, %s5609_s22  }
  0x65   :  { %s5562_s9 = scalar_lea.vmem %s152_s25, 16  ;;  %s5566_s29 = scalar_lea.vmem %s152_s25, 32 }
  0x66   :  { %p5563_p12 = scmp.ne.s32.totalorder %s152_s25, %s5562_s9  ;;  %p5567_p13 = scmp.lt.s32.totalorder %s152_s25, %s152_s25 }
  0x67   :  { %p5568_p0 = scmp.lt.s32.totalorder %s5566_s29, %s5562_s9 }
  0x69   :  { %p5569_p1 = por %p5568_p0, %p5567_p13 }
  0x6b   :  { %p5570_p2 = pnand %p5569_p1, %p5563_p12 }
  0x6d   :  { %5573 = shalt.err (!%p5570_p2)
}
  0x6e   :  { %154 = dma.hbm_to_vmem [thread:$0]  %s6520_s19, 16, %s152_s25, [#allocation15]  }
  0x6f   :  { %5594 = dma.done.wait [#allocation3], 256  }
  0x70   :  { %5595 = vsyncadd [#allocation3], 4294967040 }
  0x71   :  { %5596 = dma.done.wait [#allocation6], 32  }
  0x72   :  { %5597 = vsyncadd [#allocation6], 4294967264 }
  0x73   :  { %5598 = dma.done.wait [#allocation9], 64  }
  0x74   :  { %5599 = vsyncadd [#allocation9], 4294967232 }
  0x75   :  { %5600 = dma.done.wait [#allocation12], 64  }
  0x76   :  { %5601 = vsyncadd [#allocation12], 4294967232 }
  0x77   :  { %5602 = dma.done.wait [#allocation15], 32  }
  0x78   :  { %5603 = vsyncadd [#allocation15], 4294967264  ;;  %v5619_v0 = vmov 0   ;;  %s6534_s22 = sld [smem:[#allocation24_spill]]  ;;  %v5620_v7 = vmov 0.0   ;;  %v184_v8 = vlaneseq  ;;  %vm203_vm0 = vcmask 261120  }
  0x79   :  { %5289 = vset.pattern.permute.xlu0 %v5619_v0  ;;  %s6535_s23 = sld [smem:[#allocation26_spill]]  ;;  %v202_v15 = vld [vmem:[#allocation2] sm:$0xff]  ;;  %v359_v31 = vld [vmem:[%s6507_s6 + $0x18] sm:$0xff]  ;;  %v358_v32 = vld [vmem:[%s6507_s6 + $0x10] sm:$0xff]  ;;  %s5621_s30 = smov 120   ;;  %vm5624_vm3 = vmmov 0  }
  0x7a   :  { %v185_v9 = vand.u32 127, %v184_v8  ;;  %4983 = vmatprep.subr.mxu1 %v359_v31  ;;  %v357_v33 = vld [vmem:[%s6507_s6 + $0x8] sm:$0xff]  ;;  %v356_v34 = vld [vmem:[%s6507_s6] sm:$0xff]  ;;  %v4706_v42 = vld [vmem:[#allocation5] ss:$0 sm:$0xff]  ;;  %s5622_s1 = smov 104  }
  0x7b   :  { %4984 = vmatpush3.msra.mxu1 %v359_v31  ;;  %v4707_v44 = vld [vmem:[#allocation7] ss:$0 sm:$0xff]  ;;  %v4708_v51 = vld [vmem:[#allocation8] ss:$0 sm:$0xff]  ;;  %s5625_s19 = smov 96   ;;  %vm488_vm4 = vcmask 64512  }
  0x7c   :  { %4985 = vmatprep.subr.mxu1 %v358_v32  ;;  %s6536_s3 = sld [smem:[#allocation25_spill]]  ;;  %s5627_s18 = smov 64   ;;  %vm2365_vm7 = vcmask 523264  }
  0x7d   :  { %4986 = vmatpush3.msra.mxu1 %v358_v32 }
  0x7e   :  { %v182_v1 = vld [vmem:[%s6534_s22] sm:$0xff]  ;;  %v183_v4 = vld [vmem:[%s6534_s22 + $0x8] sm:$0xff]  ;;  %4987 = vmatprep.subr.mxu1 %v357_v33 }
  0x7f   :  { %v201_v2 = vld [vmem:[%s6535_s23 + $0x18] sm:$0xff]  ;;  %187 = vperm.xlu0 %5289, %v182_v1   ;;  %v200_v3 = vld [vmem:[%s6535_s23 + $0x10] sm:$0xff]  ;;  %v199_v5 = vld [vmem:[%s6535_s23 + $0x8] sm:$0xff]  ;;  %4988 = vmatpush3.msra.mxu1 %v357_v33 }
  0x80   :  { %4972 = vmatprep.subr.mxu0 %v201_v2  ;;  %v198_v6 = vld [vmem:[%s6535_s23] sm:$0xff]  ;;  %4989 = vmatprep.subr.mxu1 %v356_v34  ;;  %s5623_s23 = smov 112  }
  0x81   :  { %4973 = vmatpush3.msra.mxu0 %v201_v2  ;;  %4990 = vmatpush3.msra.mxu1 %v356_v34 }
  0x82   :  { %4974 = vmatprep.subr.mxu0 %v200_v3  ;;  %5009 = vmatprep.subr.mxu1 %v5620_v7 }
  0x83   :  { %4975 = vmatpush3.msra.mxu0 %v200_v3  ;;  %190 = vperm.xlu0 %5289, %v183_v4  }
  0x84   :  { %4976 = vmatprep.subr.mxu0 %v199_v5 }
  0x85   :  { %4977 = vmatpush3.msra.mxu0 %v199_v5 }
  0x86   :  { %4978 = vmatprep.subr.mxu0 %v198_v6 }
  0x87   :  { %4979 = vmatpush3.msra.mxu0 %v198_v6 }
  0x88   :  { %4994 = vmatprep.subr.mxu0 %v5620_v7 }
  0xfa   :  { %v188_v10 = vpop.permute.xlu0 %187 }
  0xfb   :  { %vm192_vm1 = vcmp.eq.s32.totalorder %v188_v10, %v185_v9 }
  0xfc   :  { %v4702_v11 = vsel %vm192_vm1, 1.0, %v5620_v7 }
  0xfd   :  { %4980 = vmatprep.mubr.msk.f32.mxu0 %vm203_vm0, %v4702_v11 }
  0xfe   :  { %v191_v12 = vpop.permute.xlu0 %190 }
  0xff   :  { %vm193_vm2 = vcmp.eq.s32.totalorder %v191_v12, %v185_v9 }
 0x100   :  { %v4703_v13 = vsel %vm193_vm2, 1.0, %v5620_v7 }
 0x101   :  { %4981 = vmatmul.mubr.msk.f32.vlgmr.msra.gmra.mxu0 %vm203_vm0, %v4703_v13 }
 0x102   :  { %4996 = vmatprep.mubr.msk.f32.mxu0 %vm5624_vm3, %v5620_v7 }
 0x1c1   :  { %v4982_v14 = vpop.f32.mrf.mxu0 }
 0x1c2   :  { %v282_v18 = vadd.f32 %v4982_v14, %v202_v15 }
 0x1c3   :  { %v276_v16 = vpop.f32.mrf.mxu0 }
 0x1c4   :  { %v277_v17 = vadd.f32 %v276_v16, %v202_v15  ;;  %v290_v20 = vsel %vm203_vm0, %v282_v18, 0.0  ;;  %v5626_v16 = vmov 1966171168  }
 0x1c6   :  { %v287_v19 = vsel %vm203_vm0, %v277_v17, 0.0 }
 0x1c7   :  { %288 = vadd.xlane.f32.xlu1 %v287_v19 }
 0x1cb   :  { %291 = vadd.xlane.f32.xlu1 %v290_v20 }
 0x250   :  { %v289_v21 = vpop.xlane.xlu1 %288 }
 0x251   :  { %v294_v22 = vmul.f32 0.03125, %v289_v21  ;;  %v338_v21 = vshrl.u32 %v184_v8, 7 }
 0x253   :  { %v296_v23 = vsub.f32 %v277_v17, %v294_v22  ;;  %v335_v17 = vunpack.c.l.s4 %v5626_v16 }
 0x254   :  { %v292_v24 = vpop.xlane.xlu1 %291 }
 0x255   :  { %v295_v25 = vmul.f32 0.03125, %v292_v24  ;;  %v298_v26 = vmul.f32 %v296_v23, %v296_v23  ;;  %v336_v20 = vunpack.c.0.s8 %v335_v17 }
 0x257   :  { %v297_v27 = vsub.f32 %v282_v18, %v295_v25  ;;  %v300_v28 = vsel %vm203_vm0, %v298_v26, 0.0  ;;  %v330_v18 = vld [vmem:[%s6536_s3] sm:$0x3] }
 0x258   :  { %301 = vadd.xlane.f32.xlu0 %v300_v28  ;;  %v331_v19 = vsub.f32 1.0, %v330_v18 }
 0x259   :  { %v299_v29 = vmul.f32 %v297_v27, %v297_v27 }
 0x25a   :  { %v332_v22 = vmul.f32 -10000.0, %v331_v19 }
 0x25b   :  { %v303_v30 = vsel %vm203_vm0, %v299_v29, 0.0 }
 0x25c   :  { %304 = vadd.xlane.f32.xlu1 %v303_v30 }
 0x2e1   :  { %v302_v35 = vpop.xlane.xlu0 %301 }
 0x2e2   :  { %v306_v36 = vmul.f32 0.03125, %v302_v35 }
 0x2e4   :  { %v308_v37 = vadd.f32 1e-12, %v306_v36 }
 0x2e5   :  { %v305_v38 = vpop.xlane.xlu1 %304 }
 0x2e6   :  { %5290 = vrsqrt.f32 %v308_v37  ;;  %v307_v39 = vmul.f32 0.03125, %v305_v38 }
 0x2e8   :  { %v309_v40 = vadd.f32 1e-12, %v307_v39 }
 0x2ea   :  { %5292 = vrsqrt.f32 %v309_v40 }
 0x2f3   :  { %v5291_v41 = vpop.eup %5290 }
 0x2f4   :  { %v312_v43 = vmul.f32 %v5291_v41, %v296_v23  ;;  %v339_v23 = vsub.s32 %v336_v20, %v338_v21 }
 0x2f6   :  { %v320_v45 = vmul.f32 %v4706_v42, %v312_v43  ;;  %v340_v24 = vrot.slane %v332_v22, %v339_v23 }
 0x2f7   :  { %v5293_v46 = vpop.eup %5292 }
 0x2f8   :  { %v313_v47 = vmul.f32 %v5293_v46, %v297_v27  ;;  %v5823_v48 = vadd.f32 %v4707_v44, %v320_v45  ;;  %v341_v25 = vcombine.high %v340_v24, %v340_v24  ;;  %v348_v26 = vrot.slane %v340_v24, %v339_v23 }
 0x2f9   :  { %v478_v27 = vsub.s32 0, %v338_v21 }
 0x2fa   :  { %v321_v49 = vmul.f32 %v4706_v42, %v313_v47  ;;  %4991 = vmatprep.mubr.msk.f32.mxu1 %vm203_vm0, %v5823_v48  ;;  %v355_v28 = vrot.slane %v341_v25, %v339_v23 }
 0x2fb   :  { %v5931_v29 = vrot.slane %v348_v26, %v478_v27 }
 0x2fc   :  { %v5827_v50 = vadd.f32 %v4707_v44, %v321_v49  ;;  %v5933_v31 = vrot.slane %v355_v28, %v478_v27 }
 0x2fe   :  { %4992 = vmatmul.mubr.msk.f32.vlgmr.msra.gmra.mxu1 %vm203_vm0, %v5827_v50 }
 0x2ff   :  { %5011 = vmatprep.mubr.msk.f32.mxu1 %vm5624_vm3, %v5620_v7 }
 0x3be   :  { %v4993_v52 = vpop.f32.mrf.mxu1 }
 0x3bf   :  { %v5831_v53 = vadd.f32 %v4993_v52, %v4708_v51 }
 0x3c0   :  { %v439_v54 = vpop.f32.mrf.mxu1 }
 0x3c1   :  { %v5833_v55 = vadd.f32 %v4708_v51, %v439_v54  ;;  %452 = vrot.lane.b32.xlu1 %v5831_v53, %s5621_s30  ;;  %v469_v1 = vmul.f32 0.35355338, %v5831_v53 }
 0x3c3   :  { %462 = vrot.lane.b32.xlu0 %v5833_v55, %s5622_s1  ;;  %v468_v63 = vmul.f32 0.35355338, %v5833_v55 }
 0x3c5   :  { %450 = vrot.lane.b32.xlu1 %v5833_v55, %s5621_s30 }
 0x3c9   :  { %456 = vrot.lane.b32.xlu1 %v5833_v55, %s5623_s23 }
 0x3cd   :  { %458 = vrot.lane.b32.xlu1 %v5831_v53, %s5623_s23 }
 0x3d1   :  { %464 = vrot.lane.b32.xlu1 %v5831_v53, %s5622_s1 }
 0x3d5   :  { %486 = vrot.lane.b32.xlu1 %v5833_v55, %s5625_s19 }
 0x3d9   :  { %564 = vrot.lane.b32.xlu1 %v5831_v53, %s5625_s19 }
 0x433   :  { %v5855_v56 = vpop.permute.xlu1 %452 }
 0x434   :  { %v471_v6 = vmul.f32 0.35355338, %v5855_v56 }
 0x435   :  { %v5867_v59 = vpop.permute.xlu0 %462 }
 0x436   :  { %v474_v12 = vmul.f32 0.35355338, %v5867_v59 }
 0x437   :  { %v5857_v57 = vpop.permute.xlu1 %450 }
 0x438   :  { %641 = vrot.lane.b32.xlu1 %v5857_v57, %s5625_s19  ;;  %v470_v3 = vmul.f32 0.35355338, %v5857_v57 }
 0x43b   :  { %v5861_v58 = vpop.permute.xlu1 %456 }
 0x43c   :  { %718 = vrot.lane.b32.xlu1 %v5855_v56, %s5625_s19  ;;  %795 = vrot.lane.b32.xlu0 %v5861_v58, %s5625_s19  ;;  %v472_v9 = vmul.f32 0.35355338, %v5861_v58 }
 0x43f   :  { %v5869_v60 = vpop.permute.xlu1 %458 }
 0x440   :  { %949 = vrot.lane.b32.xlu0 %v5867_v59, %s5625_s19  ;;  %872 = vrot.lane.b32.xlu1 %v5869_v60, %s5625_s19  ;;  %v473_v13 = vmul.f32 0.35355338, %v5869_v60 }
 0x443   :  { %v5875_v61 = vpop.permute.xlu1 %464 }
 0x444   :  { %1026 = vrot.lane.b32.xlu1 %v5875_v61, %s5625_s19  ;;  %v475_v15 = vmul.f32 0.35355338, %v5875_v61 }
 0x447   :  { %v487_v62 = vpop.permute.xlu1 %486 }
 0x448   :  { %4995 = vmatpush3.xpose.msk.msra.mxu0 %vm488_vm4, %v487_v62 }
 0x449   :  { %4999 = vmatprep.subr.mxu0 %v5620_v7 }
 0x44b   :  { %v565_v0 = vpop.permute.xlu1 %564  ;;  %4997 = vmatmul.mubr.msk.f32.vlgmr.msra.gmra.mxu0 %vm488_vm4, %v468_v63 }
 0x44c   :  { %5000 = vmatpush3.xpose.msk.msra.mxu0 %vm488_vm4, %v565_v0  ;;  %5001 = vmatprep.mubr.msk.f32.mxu0 %vm5624_vm3, %v5620_v7 }
 0x44d   :  { %5004 = vmatprep.subr.mxu0 %v5620_v7 }
 0x44f   :  { %5002 = vmatmul.mubr.msk.f32.vlgmr.msra.gmra.mxu0 %vm488_vm4, %v469_v1 }
 0x450   :  { %5006 = vmatprep.mubr.msk.f32.mxu0 %vm5624_vm3, %v5620_v7 }
 0x4aa   :  { %v642_v2 = vpop.permute.xlu1 %641 }
 0x4ab   :  { %5005 = vmatpush3.xpose.msk.msra.mxu0 %vm488_vm4, %v642_v2 }
 0x4ac   :  { %5014 = vmatprep.subr.mxu0 %v5620_v7 }
 0x4ae   :  { %v796_v4 = vpop.permute.xlu0 %795  ;;  %v719_v5 = vpop.permute.xlu1 %718  ;;  %5007 = vmatmul.mubr.msk.f32.vlgmr.msra.gmra.mxu0 %vm488_vm4, %v470_v3 }
 0x4af   :  { %5010 = vmatpush3.xpose.msk.msra.mxu1 %vm488_vm4, %v719_v5  ;;  %5015 = vmatpush3.xpose.msk.msra.mxu0 %vm488_vm4, %v796_v4 }
 0x4b0   :  { %5016 = vmatprep.mubr.msk.f32.mxu0 %vm5624_vm3, %v5620_v7  ;;  %5019 = vmatprep.subr.mxu1 %v5620_v7 }
 0x4b1   :  { %5024 = vmatprep.subr.mxu0 %v5620_v7 }
 0x4b2   :  { %v950_v10 = vpop.permute.xlu0 %949  ;;  %5012 = vmatmul.mubr.msk.f32.vlgmr.msra.gmra.mxu1 %vm488_vm4, %v471_v6  ;;  %v873_v11 = vpop.permute.xlu1 %872  ;;  %5017 = vmatmul.mubr.msk.f32.vlgmr.msra.gmra.mxu0 %vm488_vm4, %v472_v9 }
 0x4b3   :  { %5020 = vmatpush3.xpose.msk.msra.mxu1 %vm488_vm4, %v873_v11  ;;  %5025 = vmatpush3.xpose.msk.msra.mxu0 %vm488_vm4, %v950_v10 }
 0x4b4   :  { %5021 = vmatprep.mubr.msk.f32.mxu1 %vm5624_vm3, %v5620_v7  ;;  %5026 = vmatprep.mubr.msk.f32.mxu0 %vm5624_vm3, %v5620_v7 }
 0x4b5   :  { %5029 = vmatprep.subr.mxu1 %v5620_v7  ;;  %5034 = vmatprep.subr.mxu0 %v5620_v7 }
 0x4b6   :  { %5022 = vmatmul.mubr.msk.f32.vlgmr.msra.gmra.mxu1 %vm488_vm4, %v473_v13  ;;  %v1027_v14 = vpop.permute.xlu1 %1026  ;;  %5027 = vmatmul.mubr.msk.f32.vlgmr.msra.gmra.mxu0 %vm488_vm4, %v474_v12 }
 0x4b7   :  { %5030 = vmatpush3.xpose.msk.msra.mxu1 %vm488_vm4, %v1027_v14  ;;  %5031 = vmatprep.mubr.msk.f32.mxu1 %vm5624_vm3, %v5620_v7 }
 0x4b8   :  { %5039 = vmatprep.subr.mxu1 %v5620_v7  ;;  %5036 = vmatprep.mubr.msk.f32.mxu0 %vm5624_vm3, %v5620_v7 }
 0x4ba   :  { %5032 = vmatmul.mubr.msk.f32.vlgmr.msra.gmra.mxu1 %vm488_vm4, %v475_v15 }
 0x4bb   :  { %5041 = vmatprep.mubr.msk.f32.mxu1 %vm5624_vm3, %v5620_v7 }
 0x50b   :  { %v560_v30 = vpop.f32.mrf.mxu0 }
 0x50c   :  { %v561_v32 = vadd.f32 %v560_v30, %v5931_v29 }
 0x50d   :  { %v4998_v33 = vpop.f32.mrf.mxu0 }
 0x50e   :  { %v1103_v34 = vsel %vm488_vm4, %v561_v32, -inf }
 0x50f   :  { %1104 = vmax.xlane.f32.xlu0 %v1103_v34  ;;  %v637_v35 = vpop.f32.mrf.mxu0 }
 0x510   :  { %v638_v8 = vadd.f32 %v637_v35, %v5933_v31 }
 0x511   :  { %v5003_v36 = vpop.f32.mrf.mxu0 }
 0x512   :  { %v1106_v37 = vsel %vm488_vm4, %v638_v8, -inf }
 0x513   :  { %1107 = vmax.xlane.f32.xlu1 %v1106_v37 }
 0x56e   :  { %v714_v38 = vpop.f32.mrf.mxu0 }
 0x56f   :  { %v715_v39 = vadd.f32 %v714_v38, %v5931_v29 }
 0x570   :  { %v5008_v40 = vpop.f32.mrf.mxu0 }
 0x571   :  { %v1109_v41 = vsel %vm488_vm4, %v715_v39, -inf }
 0x572   :  { %v791_v42 = vpop.f32.mrf.mxu1  ;;  %1110 = vmax.xlane.f32.xlu0 %v1109_v41  ;;  %v868_v43 = vpop.f32.mrf.mxu0 }
 0x573   :  { %v792_v44 = vadd.f32 %v791_v42, %v5933_v31  ;;  %v869_v45 = vadd.f32 %v868_v43, %v5931_v29 }
 0x574   :  { %v5013_v46 = vpop.f32.mrf.mxu1  ;;  %v5018_v47 = vpop.f32.mrf.mxu0 }
 0x575   :  { %v1112_v49 = vsel %vm488_vm4, %v792_v44, -inf  ;;  %v1115_v51 = vsel %vm488_vm4, %v869_v45, -inf }
 0x576   :  { %v945_v52 = vpop.f32.mrf.mxu1  ;;  %1113 = vmax.xlane.f32.xlu0 %v1112_v49  ;;  %1116 = vmax.xlane.f32.xlu1 %v1115_v51  ;;  %v1022_v54 = vpop.f32.mrf.mxu0 }
 0x577   :  { %v946_v62 = vadd.f32 %v945_v52, %v5933_v31  ;;  %v1023_v63 = vadd.f32 %v1022_v54, %v5931_v29 }
 0x578   :  { %v5023_v0 = vpop.f32.mrf.mxu1  ;;  %v5028_v1 = vpop.f32.mrf.mxu0 }
 0x579   :  { %v1118_v2 = vsel %vm488_vm4, %v946_v62, -inf  ;;  %v1121_v3 = vsel %vm488_vm4, %v1023_v63, -inf }
 0x57a   :  { %v1099_v4 = vpop.f32.mrf.mxu1  ;;  %1119 = vmax.xlane.f32.xlu0 %v1118_v2  ;;  %1122 = vmax.xlane.f32.xlu1 %v1121_v3 }
 0x57b   :  { %v1100_v5 = vadd.f32 %v1099_v4, %v5933_v31 }
 0x57c   :  { %v5033_v6 = vpop.f32.mrf.mxu1 }
 0x57d   :  { %v1124_v9 = vsel %vm488_vm4, %v1100_v5, -inf }
 0x57e   :  { %1125 = vmax.xlane.f32.xlu0 %v1124_v9 }
 0x58b   :  { %1199 = vrot.lane.b32.xlu1 %v5833_v55, %s5627_s18 }
 0x58f   :  { %1351 = vrot.lane.b32.xlu1 %v5857_v57, %s5627_s18 }
 0x593   :  { %1427 = vrot.lane.b32.xlu1 %v5855_v56, %s5627_s18 }
 0x594   :  { %1275 = vrot.lane.b32.xlu0 %v5831_v53, %s5627_s18 }
 0x597   :  { %1579 = vrot.lane.b32.xlu1 %v5869_v60, %s5627_s18 }
 0x598   :  { %1503 = vrot.lane.b32.xlu0 %v5861_v58, %s5627_s18  ;;  %v1105_v12 = vpop.xlane.xlu0 %1104 }
 0x599   :  { %v1127_v13 = vsub.f32 %v561_v32, %v1105_v12 }
 0x59b   :  { %v1135_v14 = vmul.f32 1.442695, %v1127_v13 }
 0x59c   :  { %v1108_v10 = vpop.xlane.xlu1 %1107 }
 0x59d   :  { %v1128_v11 = vsub.f32 %v638_v8, %v1108_v10 }
 0x59f   :  { %v1137_v55 = vmul.f32 1.442695, %v1128_v11 }
 0x5a1   :  { %5294 = vpow2.f32 %v1137_v55 }
 0x5a2   :  { %5296 = vpow2.f32 %v1135_v14 }
 0x5ae   :  { %v5963_v57 = vpop.eup %5294 }
 0x5af   :  { %v1154_v56 = vsel %vm488_vm4, %v5963_v57, 0.0  ;;  %v5967_v53 = vpop.eup %5296 }
 0x5b0   :  { %v1151_v60 = vsel %vm488_vm4, %v5967_v53, 0.0 }
 0x5b7   :  { %1155 = vadd.xlane.f32.xlu0 %v1154_v56  ;;  %v1807_v56 = vld [vmem:[%s6509_s8] sm:$0xff] }
 0x5bb   :  { %1152 = vadd.xlane.f32.xlu1 %v1151_v60 }
 0x5fb   :  { %v1111_v58 = vpop.xlane.xlu0 %1110 }
 0x5fc   :  { %v1129_v15 = vsub.f32 %v715_v39, %v1111_v58 }
 0x5fe   :  { %v1139_v16 = vmul.f32 1.442695, %v1129_v15 }
 0x5ff   :  { %v1114_v17 = vpop.xlane.xlu0 %1113  ;;  %v1117_v18 = vpop.xlane.xlu1 %1116 }
 0x600   :  { %5298 = vpow2.f32 %v1139_v16  ;;  %v1130_v19 = vsub.f32 %v792_v44, %v1114_v17  ;;  %v1131_v20 = vsub.f32 %v869_v45, %v1117_v18  ;;  %v1808_v18 = vld [vmem:[%s6509_s8 + $0x8] sm:$0xff] }
 0x602   :  { %v1141_v21 = vmul.f32 1.442695, %v1130_v19  ;;  %v1143_v22 = vmul.f32 1.442695, %v1131_v20  ;;  %v1809_v19 = vld [vmem:[%s6509_s8 + $0x10] sm:$0xff]  ;;  %v1810_v20 = vld [vmem:[%s6509_s8 + $0x18] sm:$0xff] }
 0x603   :  { %v1120_v23 = vpop.xlane.xlu0 %1119  ;;  %v1123_v24 = vpop.xlane.xlu1 %1122 }
 0x604   :  { %5300 = vpow2.f32 %v1141_v21  ;;  %v1132_v25 = vsub.f32 %v946_v62, %v1120_v23  ;;  %v1133_v26 = vsub.f32 %v1023_v63, %v1123_v24 }
 0x605   :  { %5302 = vpow2.f32 %v1143_v22 }
 0x606   :  { %v1145_v27 = vmul.f32 1.442695, %v1132_v25  ;;  %v1147_v28 = vmul.f32 1.442695, %v1133_v26 }
 0x607   :  { %v1126_v30 = vpop.xlane.xlu0 %1125  ;;  %v1200_v32 = vpop.permute.xlu1 %1199 }
 0x608   :  { %5304 = vpow2.f32 %v1145_v27  ;;  %v1134_v33 = vsub.f32 %v1100_v5, %v1126_v30  ;;  %5035 = vmatpush3.msra.mxu0 %v1200_v32 }
 0x609   :  { %5306 = vpow2.f32 %v1147_v28  ;;  %5044 = vmatprep.subr.mxu0 %v5620_v7 }
 0x60a   :  { %v1149_v34 = vmul.f32 1.442695, %v1134_v33 }
 0x60b   :  { %v1276_v35 = vpop.permute.xlu0 %1275  ;;  %v1352_v47 = vpop.permute.xlu1 %1351 }
 0x60c   :  { %5308 = vpow2.f32 %v1149_v34  ;;  %5040 = vmatpush3.msra.mxu1 %v1276_v35 }
 0x60d   :  { %v5299_v8 = vpop.eup %5298  ;;  %5049 = vmatprep.subr.mxu1 %v5620_v7 }
 0x60e   :  { %v1157_v36 = vsel %vm488_vm4, %v5299_v8, 0.0 }
 0x60f   :  { %1158 = vadd.xlane.f32.xlu1 %v1157_v36  ;;  %v1428_v49 = vpop.permute.xlu1 %1427  ;;  %v1504_v51 = vpop.permute.xlu0 %1503 }
 0x611   :  { %v5301_v37 = vpop.eup %5300 }
 0x612   :  { %v5303_v38 = vpop.eup %5302  ;;  %v1160_v39 = vsel %vm488_vm4, %v5301_v37, 0.0 }
 0x613   :  { %1161 = vadd.xlane.f32.xlu0 %v1160_v39  ;;  %v1163_v40 = vsel %vm488_vm4, %v5303_v38, 0.0  ;;  %v1580_v52 = vpop.permute.xlu1 %1579 }
 0x614   :  { %1164 = vadd.xlane.f32.xlu1 %v1163_v40 }
 0x615   :  { %v5976_v41 = vpop.eup %5304 }
 0x616   :  { %v5978_v42 = vpop.eup %5306  ;;  %v1166_v43 = vsel %vm488_vm4, %v5976_v41, 0.0 }
 0x617   :  { %1167 = vadd.xlane.f32.xlu0 %v1166_v43  ;;  %v1169_v44 = vsel %vm488_vm4, %v5978_v42, 0.0 }
 0x618   :  { %1170 = vadd.xlane.f32.xlu1 %v1169_v44 }
 0x619   :  { %v5984_v45 = vpop.eup %5308 }
 0x61a   :  { %v1172_v46 = vsel %vm488_vm4, %v5984_v45, 0.0 }
 0x61b   :  { %1173 = vadd.xlane.f32.xlu0 %v1172_v46 }
 0x629   :  { %1731 = vrot.lane.b32.xlu1 %v5875_v61, %s5627_s18 }
 0x631   :  { %1655 = vrot.lane.b32.xlu0 %v5867_v59, %s5627_s18 }
 0x640   :  { %v1156_v54 = vpop.xlane.xlu0 %1155 }
 0x641   :  { %5310 = vrcp.f32 %v1156_v54 }
 0x644   :  { %v1153_v62 = vpop.xlane.xlu1 %1152 }
 0x645   :  { %5312 = vrcp.f32 %v1153_v62 }
 0x64e   :  { %v5311_v63 = vpop.eup %5310 }
 0x64f   :  { %v1184_v0 = vmul.f32 %v5311_v63, %v5963_v57 }
 0x651   :  { %1192 = vst.msk [vmem:[%s6522_s21 + $0x8] sm:$0xff] %vm488_vm4, %v1184_v0  ;;  %5042 = vmatmul.mubr.msk.f32.vlgmr.msra.gmra.mxu1 %vm488_vm4, %v1184_v0 }
 0x652   :  { %v5313_v61 = vpop.eup %5312  ;;  %5050 = vmatpush3.msra.mxu1 %v1428_v49  ;;  %5051 = vmatprep.mubr.msk.f32.mxu1 %vm5624_vm3, %v5620_v7 }
 0x653   :  { %v1183_v59 = vmul.f32 %v5313_v61, %v5967_v53  ;;  %5059 = vmatprep.subr.mxu1 %v5620_v7  ;;  %v4743_v61 = vld [vmem:[#allocation10] ss:$0 sm:$0xff] }
 0x655   :  { %1191 = vst.msk [vmem:[%s6522_s21] sm:$0xff] %vm488_vm4, %v1183_v59  ;;  %5037 = vmatmul.mubr.msk.f32.vlgmr.msra.gmra.mxu0 %vm488_vm4, %v1183_v59 }
 0x656   :  { %5045 = vmatpush3.msra.mxu0 %v1352_v47  ;;  %5046 = vmatprep.mubr.msk.f32.mxu0 %vm5624_vm3, %v5620_v7 }
 0x657   :  { %5054 = vmatprep.subr.mxu0 %v5620_v7 }
 0x698   :  { %v1159_v1 = vpop.xlane.xlu1 %1158 }
 0x699   :  { %5314 = vrcp.f32 %v1159_v1 }
 0x69c   :  { %v1162_v2 = vpop.xlane.xlu0 %1161 }
 0x69d   :  { %5316 = vrcp.f32 %v1162_v2  ;;  %v1165_v3 = vpop.xlane.xlu1 %1164 }
 0x69e   :  { %5318 = vrcp.f32 %v1165_v3 }
 0x6a0   :  { %v1168_v4 = vpop.xlane.xlu0 %1167 }
 0x6a1   :  { %5320 = vrcp.f32 %v1168_v4  ;;  %v1171_v5 = vpop.xlane.xlu1 %1170 }
 0x6a2   :  { %5322 = vrcp.f32 %v1171_v5 }
 0x6a4   :  { %v1174_v6 = vpop.xlane.xlu0 %1173 }
 0x6a5   :  { %5324 = vrcp.f32 %v1174_v6  ;;  %v1732_v15 = vpop.permute.xlu1 %1731 }
 0x6a6   :  { %v5315_v9 = vpop.eup %5314 }
 0x6a7   :  { %v1185_v10 = vmul.f32 %v5315_v9, %v5299_v8 }
 0x6a8   :  { %v1656_v57 = vpop.permute.xlu0 %1655 }
 0x6a9   :  { %1193 = vst.msk [vmem:[%s6522_s21 + $0x10] sm:$0xff] %vm488_vm4, %v1185_v10  ;;  %5047 = vmatmul.mubr.msk.f32.vlgmr.msra.gmra.mxu0 %vm488_vm4, %v1185_v10 }
 0x6aa   :  { %v5317_v11 = vpop.eup %5316  ;;  %5055 = vmatpush3.msra.mxu0 %v1504_v51  ;;  %5056 = vmatprep.mubr.msk.f32.mxu0 %vm5624_vm3, %v5620_v7 }
 0x6ab   :  { %v5319_v12 = vpop.eup %5318  ;;  %5064 = vmatprep.subr.mxu0 %v5620_v7  ;;  %v1186_v13 = vmul.f32 %v5317_v11, %v5301_v37 }
 0x6ac   :  { %v1187_v55 = vmul.f32 %v5319_v12, %v5303_v38 }
 0x6ad   :  { %1194 = vst.msk [vmem:[%s6522_s21 + $0x18] sm:$0xff] %vm488_vm4, %v1186_v13  ;;  %5052 = vmatmul.mubr.msk.f32.vlgmr.msra.gmra.mxu1 %vm488_vm4, %v1186_v13 }
 0x6ae   :  { %v5321_v14 = vpop.eup %5320  ;;  %1195 = vst.msk [vmem:[%s6522_s21 + $0x20] sm:$0xff] %vm488_vm4, %v1187_v55  ;;  %5057 = vmatmul.mubr.msk.f32.vlgmr.msra.gmra.mxu0 %vm488_vm4, %v1187_v55  ;;  %5060 = vmatpush3.msra.mxu1 %v1580_v52 }
 0x6af   :  { %v5323_v53 = vpop.eup %5322  ;;  %5065 = vmatpush3.msra.mxu0 %v1656_v57  ;;  %5061 = vmatprep.mubr.msk.f32.mxu1 %vm5624_vm3, %v5620_v7  ;;  %v1188_v60 = vmul.f32 %v5321_v14, %v5976_v41 }
 0x6b0   :  { %5066 = vmatprep.mubr.msk.f32.mxu0 %vm5624_vm3, %v5620_v7  ;;  %5069 = vmatprep.subr.mxu1 %v5620_v7  ;;  %v1189_v58 = vmul.f32 %v5323_v53, %v5978_v42 }
 0x6b1   :  { %1196 = vst.msk [vmem:[%s6522_s21 + $0x28] sm:$0xff] %vm488_vm4, %v1188_v60  ;;  %5062 = vmatmul.mubr.msk.f32.vlgmr.msra.gmra.mxu1 %vm488_vm4, %v1188_v60  ;;  %5074 = vmatprep.subr.mxu0 %v1807_v56 }
 0x6b2   :  { %v5325_v16 = vpop.eup %5324  ;;  %1197 = vst.msk [vmem:[%s6522_s21 + $0x30] sm:$0xff] %vm488_vm4, %v1189_v58  ;;  %5067 = vmatmul.mubr.msk.f32.vlgmr.msra.gmra.mxu0 %vm488_vm4, %v1189_v58  ;;  %5070 = vmatpush3.msra.mxu1 %v1732_v15 }
 0x6b3   :  { %5071 = vmatprep.mubr.msk.f32.mxu1 %vm5624_vm3, %v5620_v7  ;;  %v1190_v17 = vmul.f32 %v5325_v16, %v5984_v45  ;;  %5075 = vmatpush3.msra.mxu0 %v1807_v56  ;;  %v2206_v16 = vld [vmem:[%s6513_s12 + $0x10] sm:$0xff] }
 0x6b4   :  { %5079 = vmatprep.subr.mxu1 %v1808_v18  ;;  %5084 = vmatprep.subr.mxu0 %v1809_v19 }
 0x6b5   :  { %1198 = vst.msk [vmem:[%s6522_s21 + $0x38] sm:$0xff] %vm488_vm4, %v1190_v17  ;;  %5072 = vmatmul.mubr.msk.f32.vlgmr.msra.gmra.mxu1 %vm488_vm4, %v1190_v17  ;;  %v2205_v17 = vld [vmem:[%s6513_s12 + $0x8] sm:$0xff] }
 0x6b6   :  { %5080 = vmatpush3.msra.mxu1 %v1808_v18  ;;  %v2204_v18 = vld [vmem:[%s6513_s12] sm:$0xff] }
 0x6b7   :  { %5089 = vmatprep.subr.mxu1 %v1810_v20 }
 0x711   :  { %v1347_v21 = vpop.f32.mrf.mxu1 }
 0x713   :  { %v5043_v22 = vpop.f32.mrf.mxu1 }
 0x715   :  { %v1271_v23 = vpop.f32.mrf.mxu0 }
 0x716   :  { %5076 = vmatprep.mubr.msk.f32.mxu0 %vm488_vm4, %v1271_v23 }
 0x717   :  { %v5038_v24 = vpop.f32.mrf.mxu0  ;;  %5077 = vmatmul.mubr.msk.f32.vlgmr.msra.gmra.mxu0 %vm488_vm4, %v1347_v21 }
 0x718   :  { %5085 = vmatpush3.msra.mxu0 %v1809_v19 }
 0x769   :  { %v1423_v25 = vpop.f32.mrf.mxu0 }
 0x76a   :  { %5081 = vmatprep.mubr.msk.f32.mxu1 %vm488_vm4, %v1423_v25 }
 0x76b   :  { %v5048_v26 = vpop.f32.mrf.mxu0 }
 0x76c   :  { %v4744_v26 = vld [vmem:[%s6511_s10] ss:$0 sm:$0xff] }
 0x76d   :  { %v1499_v27 = vpop.f32.mrf.mxu1 }
 0x76e   :  { %v1575_v28 = vpop.f32.mrf.mxu0  ;;  %5082 = vmatmul.mubr.msk.f32.vlgmr.msra.gmra.mxu1 %vm488_vm4, %v1499_v27 }
 0x76f   :  { %5086 = vmatprep.mubr.msk.f32.mxu0 %vm488_vm4, %v1575_v28  ;;  %v5053_v30 = vpop.f32.mrf.mxu1  ;;  %5090 = vmatpush3.msra.mxu1 %v1810_v20  ;;  %v4745_v28 = vld [vmem:[%s6512_s11] ss:$0 sm:$0xff] }
 0x770   :  { %v5058_v32 = vpop.f32.mrf.mxu0 }
 0x771   :  { %v1651_v33 = vpop.f32.mrf.mxu1 }
 0x772   :  { %v1727_v34 = vpop.f32.mrf.mxu0  ;;  %5087 = vmatmul.mubr.msk.f32.vlgmr.msra.gmra.mxu0 %vm488_vm4, %v1651_v33 }
 0x773   :  { %5091 = vmatprep.mubr.msk.f32.mxu1 %vm488_vm4, %v1727_v34  ;;  %v5063_v35 = vpop.f32.mrf.mxu1 }
 0x774   :  { %v5068_v8 = vpop.f32.mrf.mxu0 }
 0x775   :  { %v1803_v36 = vpop.f32.mrf.mxu1 }
 0x776   :  { %5092 = vmatmul.mubr.msk.f32.vlgmr.msra.gmra.mxu1 %vm488_vm4, %v1803_v36  ;;  %v2357_v36 = vld [vmem:[%s6515_s14 + $0x38] sm:$0xff] }
 0x777   :  { %v5073_v37 = vpop.f32.mrf.mxu1  ;;  %5105 = vmatprep.subr.mxu1 %v2357_v36 }
 0x778   :  { %5106 = vmatpush3.msra.mxu1 %v2357_v36  ;;  %v2356_v37 = vld [vmem:[%s6515_s14 + $0x30] sm:$0xff] }
 0x779   :  { %5107 = vmatprep.subr.mxu1 %v2356_v37 }
 0x77a   :  { %5108 = vmatpush3.msra.mxu1 %v2356_v37 }
 0x7d7   :  { %v5078_v38 = vpop.f32.mrf.mxu0 }
 0x7d8   :  { %v2142_v44 = vsel %vm203_vm0, %v5078_v38, 0.0  ;;  %v2355_v38 = vld [vmem:[%s6515_s14 + $0x28] sm:$0xff] }
 0x7d9   :  { %v1883_v40 = vpop.f32.mrf.mxu0  ;;  %5109 = vmatprep.subr.mxu1 %v2355_v38 }
 0x7da   :  { %v2135_v51 = vsel %vm203_vm0, %v1883_v40, 0.0  ;;  %5110 = vmatpush3.msra.mxu1 %v2355_v38  ;;  %v2353_v40 = vld [vmem:[%s6515_s14 + $0x18] sm:$0xff] }
 0x82e   :  { %v5083_v39 = vpop.f32.mrf.mxu1 }
 0x82f   :  { %v2143_v42 = vsel %vm203_vm0, %v5083_v39, 0.0  ;;  %v2354_v39 = vld [vmem:[%s6515_s14 + $0x20] sm:$0xff] }
 0x830   :  { %v1964_v41 = vpop.f32.mrf.mxu1  ;;  %v2144_v47 = vadd.f32 %v2143_v42, %v2142_v44  ;;  %5111 = vmatprep.subr.mxu1 %v2354_v39  ;;  %v2351_v42 = vld [vmem:[%s6515_s14 + $0x8] sm:$0xff]  ;;  %v4746_v44 = vld [vmem:[#allocation11] ss:$0 sm:$0xff] }
 0x831   :  { %v2136_v45 = vsel %vm203_vm0, %v1964_v41, 0.0  ;;  %5112 = vmatpush3.msra.mxu1 %v2354_v39  ;;  %v2352_v41 = vld [vmem:[%s6515_s14 + $0x10] sm:$0xff] }
 0x832   :  { %v5088_v43 = vpop.f32.mrf.mxu0  ;;  %v2137_v54 = vadd.f32 %v2136_v45, %v2135_v51  ;;  %5113 = vmatprep.subr.mxu1 %v2353_v40 }
 0x833   :  { %v2145_v46 = vsel %vm203_vm0, %v5088_v43, 0.0  ;;  %5114 = vmatpush3.msra.mxu1 %v2353_v40  ;;  %v2350_v43 = vld [vmem:[%s6515_s14] sm:$0xff] }
 0x834   :  { %v2045_v49 = vpop.f32.mrf.mxu0  ;;  %v2146_v62 = vadd.f32 %v2145_v46, %v2144_v47  ;;  %5115 = vmatprep.subr.mxu1 %v2352_v41 }
 0x835   :  { %v2138_v52 = vsel %vm203_vm0, %v2045_v49, 0.0  ;;  %5116 = vmatpush3.msra.mxu1 %v2352_v41  ;;  %v4749_v41 = vld [vmem:[#allocation13] ss:$0 sm:$0xff] }
 0x836   :  { %v5093_v63 = vpop.f32.mrf.mxu1  ;;  %v2139_v59 = vadd.f32 %v2138_v52, %v2137_v54  ;;  %5117 = vmatprep.subr.mxu1 %v2351_v42 }
 0x837   :  { %v2147_v0 = vsel %vm203_vm0, %v5093_v63, 0.0  ;;  %5118 = vmatpush3.msra.mxu1 %v2351_v42 }
 0x838   :  { %v2148_v1 = vadd.f32 %v2147_v0, %v2146_v62  ;;  %v2126_v2 = vpop.f32.mrf.mxu1  ;;  %5119 = vmatprep.subr.mxu1 %v2350_v43 }
 0x839   :  { %v2140_v3 = vsel %vm203_vm0, %v2126_v2, 0.0  ;;  %5120 = vmatpush3.msra.mxu1 %v2350_v43 }
 0x83a   :  { %v2157_v4 = vadd.f32 %v4743_v61, %v2148_v1  ;;  %v2141_v5 = vadd.f32 %v2140_v3, %v2139_v59  ;;  %5140 = vmatprep.subr.mxu1 %v5620_v7 }
 0x83c   :  { %v2156_v6 = vadd.f32 %v4743_v61, %v2141_v5  ;;  %v2159_v9 = vadd.f32 %v2157_v4, %v5827_v50 }
 0x83e   :  { %v2165_v10 = vsel %vm203_vm0, %v2159_v9, 0.0  ;;  %v2158_v11 = vadd.f32 %v2156_v6, %v5823_v48  ;;  %v2207_v48 = vld [vmem:[%s6513_s12 + $0x18] sm:$0xff] }
 0x83f   :  { %2166 = vadd.xlane.f32.xlu1 %v2165_v10  ;;  %5094 = vmatprep.subr.mxu0 %v2207_v48 }
 0x840   :  { %v2162_v12 = vsel %vm203_vm0, %v2158_v11, 0.0  ;;  %5095 = vmatpush3.msra.mxu0 %v2207_v48 }
 0x841   :  { %2163 = vadd.xlane.f32.xlu0 %v2162_v12  ;;  %5096 = vmatprep.subr.mxu0 %v2206_v16 }
 0x842   :  { %5097 = vmatpush3.msra.mxu0 %v2206_v16 }
 0x843   :  { %5098 = vmatprep.subr.mxu0 %v2205_v17 }
 0x844   :  { %5099 = vmatpush3.msra.mxu0 %v2205_v17 }
 0x845   :  { %5100 = vmatprep.subr.mxu0 %v2204_v18 }
 0x846   :  { %5101 = vmatpush3.msra.mxu0 %v2204_v18 }
 0x8c8   :  { %v2167_v13 = vpop.xlane.xlu1 %2166 }
 0x8c9   :  { %v2169_v55 = vmul.f32 0.03125, %v2167_v13 }
 0x8ca   :  { %v2164_v14 = vpop.xlane.xlu0 %2163 }
 0x8cb   :  { %v2168_v57 = vmul.f32 0.03125, %v2164_v14  ;;  %v2171_v56 = vsub.f32 %v2159_v9, %v2169_v55 }
 0x8cd   :  { %v2170_v53 = vsub.f32 %v2158_v11, %v2168_v57  ;;  %v2173_v15 = vmul.f32 %v2171_v56, %v2171_v56 }
 0x8cf   :  { %v2172_v60 = vmul.f32 %v2170_v53, %v2170_v53  ;;  %v2177_v50 = vsel %vm203_vm0, %v2173_v15, 0.0 }
 0x8d1   :  { %v2174_v58 = vsel %vm203_vm0, %v2172_v60, 0.0 }
 0x8d2   :  { %2175 = vadd.xlane.f32.xlu0 %v2174_v58 }
 0x8d6   :  { %2178 = vadd.xlane.f32.xlu0 %v2177_v50 }
 0x95b   :  { %v2176_v19 = vpop.xlane.xlu0 %2175 }
 0x95c   :  { %v2180_v20 = vmul.f32 0.03125, %v2176_v19 }
 0x95e   :  { %v2182_v21 = vadd.f32 1e-12, %v2180_v20 }
 0x95f   :  { %v2179_v22 = vpop.xlane.xlu0 %2178 }
 0x960   :  { %5326 = vrsqrt.f32 %v2182_v21  ;;  %v2181_v23 = vmul.f32 0.03125, %v2179_v22 }
 0x962   :  { %v2183_v24 = vadd.f32 1e-12, %v2181_v23 }
 0x964   :  { %5328 = vrsqrt.f32 %v2183_v24 }
 0x96d   :  { %v5327_v25 = vpop.eup %5326 }
 0x96e   :  { %v2186_v27 = vmul.f32 %v5327_v25, %v2170_v53  ;;  %v5628_v25 = vmov -1.0  }
 0x970   :  { %v2194_v30 = vmul.f32 %v4744_v26, %v2186_v27 }
 0x971   :  { %v5329_v32 = vpop.eup %5328 }
 0x972   :  { %v2187_v33 = vmul.f32 %v5329_v32, %v2171_v56  ;;  %v6105_v34 = vadd.f32 %v4745_v28, %v2194_v30 }
 0x974   :  { %v2195_v35 = vmul.f32 %v4744_v26, %v2187_v33  ;;  %5102 = vmatprep.mubr.msk.f32.mxu0 %vm203_vm0, %v6105_v34 }
 0x976   :  { %v6109_v8 = vadd.f32 %v4745_v28, %v2195_v35 }
 0x978   :  { %5103 = vmatmul.mubr.msk.f32.vlgmr.msra.gmra.mxu0 %vm203_vm0, %v6109_v8 }
 0xa38   :  { %v5104_v45 = vpop.f32.mrf.mxu0 }
 0xa39   :  { %v2293_v46 = vadd.f32 %v5104_v45, %v4746_v44 }
 0xa3a   :  { %v2287_v47 = vpop.f32.mrf.mxu0 }
 0xa3b   :  { %v2299_v49 = vmul.f32 0.70710677, %v2293_v46  ;;  %v2288_v51 = vadd.f32 %v4746_v44, %v2287_v47  ;;  %v2297_v38 = vmul.f32 0.5, %v2293_v46 }
 0xa3d   :  { %v2305_v52 = vand.u32 2147483647, %v2299_v49  ;;  %v2298_v54 = vmul.f32 0.70710677, %v2288_v51  ;;  %vm2301_vm5 = vcmp.ge.f32.partialorder %v2299_v49, 0.0  ;;  %v2296_v36 = vmul.f32 0.5, %v2288_v51 }
 0xa3e   :  { %v2303_v26 = vsel %vm2301_vm5, 1.0, %v5628_v25 }
 0xa3f   :  { %v2307_v62 = vmul.f32 0.3275911, %v2305_v52  ;;  %v2304_v63 = vand.u32 2147483647, %v2298_v54  ;;  %v2333_v1 = vsub.f32 0.0, %v2305_v52  ;;  %vm2300_vm6 = vcmp.ge.f32.partialorder %v2298_v54, 0.0 }
 0xa40   :  { %v2302_v32 = vsel %vm2300_vm6, 1.0, %v5628_v25 }
 0xa41   :  { %v2309_v0 = vadd.f32 1.0, %v2307_v62  ;;  %v2306_v61 = vmul.f32 0.3275911, %v2304_v63  ;;  %v2332_v2 = vsub.f32 0.0, %v2304_v63  ;;  %v2335_v3 = vmul.f32 %v2333_v1, %v2305_v52 }
 0xa43   :  { %5330 = vrcp.f32 %v2309_v0  ;;  %v2308_v59 = vadd.f32 1.0, %v2306_v61  ;;  %v2334_v5 = vmul.f32 %v2332_v2, %v2304_v63  ;;  %v2338_v9 = vmul.f32 1.442695, %v2335_v3  ;;  %v4756_v3 = vld [vmem:[%s6507_s6 + $0x30] sm:$0xff] }
 0xa45   :  { %5332 = vrcp.f32 %v2308_v59  ;;  %v2336_v13 = vmul.f32 1.442695, %v2334_v5  ;;  %v4754_v5 = vld [vmem:[%s6507_s6 + $0x20] sm:$0xff] }
 0xa46   :  { %5334 = vpow2.f32 %v2338_v9 }
 0xa47   :  { %5336 = vpow2.f32 %v2336_v13 }
 0xa50   :  { %v5331_v4 = vpop.eup %5330 }
 0xa51   :  { %v2315_v6 = vmul.f32 1.0614054, %v5331_v4 }
 0xa52   :  { %v5333_v10 = vpop.eup %5332 }
 0xa53   :  { %v2317_v11 = vadd.f32 -1.4531521, %v2315_v6  ;;  %v2314_v12 = vmul.f32 1.0614054, %v5333_v10  ;;  %v5335_v19 = vpop.eup %5334 }
 0xa54   :  { %v5337_v23 = vpop.eup %5336 }
 0xa55   :  { %v2319_v55 = vmul.f32 %v5331_v4, %v2317_v11  ;;  %v2316_v14 = vadd.f32 -1.4531521, %v2314_v12 }
 0xa57   :  { %v2321_v57 = vadd.f32 1.4214138, %v2319_v55  ;;  %v2318_v56 = vmul.f32 %v5333_v10, %v2316_v14  ;;  %v4752_v14 = vld [vmem:[%s6517_s16] ss:$0 sm:$0xff] }
 0xa59   :  { %v2323_v53 = vmul.f32 %v5331_v4, %v2321_v57  ;;  %v2320_v60 = vadd.f32 1.4214138, %v2318_v56 }
 0xa5b   :  { %v2325_v58 = vadd.f32 -0.28449672, %v2323_v53  ;;  %v2322_v15 = vmul.f32 %v5333_v10, %v2320_v60 }
 0xa5d   :  { %v2327_v50 = vmul.f32 %v5331_v4, %v2325_v58  ;;  %v2324_v48 = vadd.f32 -0.28449672, %v2322_v15  ;;  %v4753_v58 = vld [vmem:[%s6518_s17] ss:$0 sm:$0xff] }
 0xa5f   :  { %v2329_v16 = vadd.f32 0.2548296, %v2327_v50  ;;  %v2326_v17 = vmul.f32 %v5333_v10, %v2324_v48 }
 0xa61   :  { %v2331_v18 = vmul.f32 %v5331_v4, %v2329_v16  ;;  %v2328_v20 = vadd.f32 0.2548296, %v2326_v17  ;;  %v4755_v4 = vld [vmem:[%s6507_s6 + $0x28] sm:$0xff]  ;;  %v4758_v16 = vld [vmem:[#allocation8 + $0x1] ss:$0 sm:$0xff] }
 0xa63   :  { %v2341_v21 = vmul.f32 %v5335_v19, %v2331_v18  ;;  %v2330_v22 = vmul.f32 %v5333_v10, %v2328_v20 }
 0xa65   :  { %v2343_v24 = vsub.f32 1.0, %v2341_v21  ;;  %v2340_v27 = vmul.f32 %v5337_v23, %v2330_v22 }
 0xa67   :  { %v2345_v28 = vmul.f32 %v2343_v24, %v2303_v26  ;;  %v2342_v30 = vsub.f32 1.0, %v2340_v27 }
 0xa69   :  { %v2344_v33 = vmul.f32 %v2342_v30, %v2302_v32  ;;  %v2347_v35 = vadd.f32 1.0, %v2345_v28 }
 0xa6b   :  { %v2346_v37 = vadd.f32 1.0, %v2344_v33  ;;  %v2349_v40 = vmul.f32 %v2347_v35, %v2297_v38 }
 0xa6d   :  { %v2348_v39 = vmul.f32 %v2346_v37, %v2296_v36 }
 0xa6f   :  { %5121 = vmatprep.mubr.msk.f32.mxu1 %vm2365_vm7, %v2348_v39 }
 0xa70   :  { %5122 = vmatmul.mubr.msk.f32.vlgmr.msra.gmra.mxu1 %vm2365_vm7, %v2349_v40 }
 0xa71   :  { %5142 = vmatprep.mubr.msk.f32.mxu1 %vm5624_vm3, %v5620_v7 }
 0xb30   :  { %v5123_v42 = vpop.f32.mrf.mxu1 }
 0xb31   :  { %v2444_v43 = vadd.f32 %v5123_v42, %v4749_v41 }
 0xb32   :  { %v2438_v44 = vpop.f32.mrf.mxu1 }
 0xb33   :  { %v2439_v45 = vadd.f32 %v4749_v41, %v2438_v44  ;;  %v2448_v47 = vadd.f32 %v2444_v43, %v6109_v8 }
 0xb35   :  { %v2454_v49 = vsel %vm203_vm0, %v2448_v47, 0.0  ;;  %v2447_v46 = vadd.f32 %v2439_v45, %v6105_v34  ;;  %v4757_v34 = vld [vmem:[%s6507_s6 + $0x38] sm:$0xff] }
 0xb36   :  { %2455 = vadd.xlane.f32.xlu0 %v2454_v49  ;;  %5124 = vmatprep.subr.mxu0 %v4757_v34 }
 0xb37   :  { %v2451_v51 = vsel %vm203_vm0, %v2447_v46, 0.0  ;;  %5125 = vmatpush3.msra.mxu0 %v4757_v34 }
 0xb38   :  { %2452 = vadd.xlane.f32.xlu1 %v2451_v51  ;;  %5126 = vmatprep.subr.mxu0 %v4756_v3 }
 0xb39   :  { %5127 = vmatpush3.msra.mxu0 %v4756_v3 }
 0xb3a   :  { %5128 = vmatprep.subr.mxu0 %v4755_v4 }
 0xb3b   :  { %5129 = vmatpush3.msra.mxu0 %v4755_v4 }
 0xb3c   :  { %5130 = vmatprep.subr.mxu0 %v4754_v5 }
 0xb3d   :  { %5131 = vmatpush3.msra.mxu0 %v4754_v5 }
 0xb3e   :  { %5135 = vmatprep.subr.mxu0 %v5620_v7 }
 0xbbf   :  { %v2456_v52 = vpop.xlane.xlu0 %2455 }
 0xbc0   :  { %v2458_v54 = vmul.f32 0.03125, %v2456_v52 }
 0xbc1   :  { %v2453_v62 = vpop.xlane.xlu1 %2452 }
 0xbc2   :  { %v2460_v63 = vsub.f32 %v2448_v47, %v2458_v54  ;;  %v2457_v0 = vmul.f32 0.03125, %v2453_v62 }
 0xbc4   :  { %v2459_v61 = vsub.f32 %v2447_v46, %v2457_v0  ;;  %v2462_v59 = vmul.f32 %v2460_v63, %v2460_v63 }
 0xbc6   :  { %v2466_v1 = vsel %vm203_vm0, %v2462_v59, 0.0  ;;  %v2461_v2 = vmul.f32 %v2459_v61, %v2459_v61 }
 0xbc7   :  { %2467 = vadd.xlane.f32.xlu0 %v2466_v1 }
 0xbc8   :  { %v2463_v8 = vsel %vm203_vm0, %v2461_v2, 0.0 }
 0xbc9   :  { %2464 = vadd.xlane.f32.xlu1 %v2463_v8 }
 0xc50   :  { %v2468_v6 = vpop.xlane.xlu0 %2467 }
 0xc51   :  { %v2470_v9 = vmul.f32 0.03125, %v2468_v6 }
 0xc52   :  { %v2465_v10 = vpop.xlane.xlu1 %2464 }
 0xc53   :  { %v2472_v11 = vadd.f32 1e-12, %v2470_v9  ;;  %v2469_v12 = vmul.f32 0.03125, %v2465_v10 }
 0xc55   :  { %5338 = vrsqrt.f32 %v2472_v11  ;;  %v2471_v13 = vadd.f32 1e-12, %v2469_v12 }
 0xc57   :  { %5340 = vrsqrt.f32 %v2471_v13 }
 0xc62   :  { %v5339_v55 = vpop.eup %5338 }
 0xc63   :  { %v2476_v57 = vmul.f32 %v5339_v55, %v2460_v63 }
 0xc64   :  { %v5341_v56 = vpop.eup %5340 }
 0xc65   :  { %v2475_v53 = vmul.f32 %v5341_v56, %v2459_v61  ;;  %v2484_v60 = vmul.f32 %v4752_v14, %v2476_v57 }
 0xc67   :  { %v2483_v15 = vmul.f32 %v4752_v14, %v2475_v53  ;;  %v6171_v48 = vadd.f32 %v4753_v58, %v2484_v60 }
 0xc69   :  { %v6169_v50 = vadd.f32 %v4753_v58, %v2483_v15 }
 0xc6b   :  { %5132 = vmatprep.mubr.msk.f32.mxu0 %vm203_vm0, %v6169_v50 }
 0xc6c   :  { %5133 = vmatmul.mubr.msk.f32.vlgmr.msra.gmra.mxu0 %vm203_vm0, %v6171_v48 }
 0xc6d   :  { %5137 = vmatprep.mubr.msk.f32.mxu0 %vm5624_vm3, %v5620_v7 }
 0xd2c   :  { %v5134_v17 = vpop.f32.mrf.mxu0 }
 0xd2d   :  { %v6179_v18 = vadd.f32 %v5134_v17, %v4758_v16 }
 0xd2e   :  { %v2578_v19 = vpop.f32.mrf.mxu0 }
 0xd2f   :  { %v6181_v20 = vadd.f32 %v4758_v16, %v2578_v19  ;;  %2591 = vrot.lane.b32.xlu0 %v6179_v18, %s5621_s30  ;;  %v2608_v33 = vmul.f32 0.35355338, %v6179_v18 }
 0xd31   :  { %2589 = vrot.lane.b32.xlu1 %v6181_v20, %s5621_s30  ;;  %v2607_v28 = vmul.f32 0.35355338, %v6181_v20 }
 0xd33   :  { %2601 = vrot.lane.b32.xlu0 %v6181_v20, %s5622_s1 }
 0xd35   :  { %2595 = vrot.lane.b32.xlu1 %v6181_v20, %s5623_s23 }
 0xd37   :  { %2615 = vrot.lane.b32.xlu0 %v6181_v20, %s5625_s19 }
 0xd39   :  { %2597 = vrot.lane.b32.xlu1 %v6179_v18, %s5623_s23 }
 0xd3d   :  { %2603 = vrot.lane.b32.xlu1 %v6179_v18, %s5622_s1 }
 0xd41   :  { %2692 = vrot.lane.b32.xlu1 %v6179_v18, %s5625_s19 }
 0xda1   :  { %v6199_v21 = vpop.permute.xlu0 %2591 }
 0xda2   :  { %2846 = vrot.lane.b32.xlu1 %v6199_v21, %s5625_s19  ;;  %v2610_v36 = vmul.f32 0.35355338, %v6199_v21 }
 0xda3   :  { %v6203_v22 = vpop.permute.xlu1 %2589 }
 0xda4   :  { %2769 = vrot.lane.b32.xlu0 %v6203_v22, %s5625_s19  ;;  %v2609_v38 = vmul.f32 0.35355338, %v6203_v22 }
 0xda5   :  { %v6207_v23 = vpop.permute.xlu0 %2601 }
 0xda6   :  { %v2613_v43 = vmul.f32 0.35355338, %v6207_v23 }
 0xda7   :  { %v6209_v24 = vpop.permute.xlu1 %2595 }
 0xda8   :  { %2923 = vrot.lane.b32.xlu0 %v6209_v24, %s5625_s19  ;;  %v2611_v40 = vmul.f32 0.35355338, %v6209_v24 }
 0xda9   :  { %v2616_v26 = vpop.permute.xlu0 %2615 }
 0xdaa   :  { %5136 = vmatpush3.xpose.msk.msra.mxu0 %vm488_vm4, %v2616_v26 }
 0xdab   :  { %v6214_v27 = vpop.permute.xlu1 %2597  ;;  %5145 = vmatprep.subr.mxu0 %v5620_v7 }
 0xdac   :  { %3077 = vrot.lane.b32.xlu0 %v6207_v23, %s5625_s19  ;;  %3000 = vrot.lane.b32.xlu1 %v6214_v27, %s5625_s19  ;;  %v2612_v44 = vmul.f32 0.35355338, %v6214_v27 }
 0xdad   :  { %5138 = vmatmul.mubr.msk.f32.vlgmr.msra.gmra.mxu0 %vm488_vm4, %v2607_v28 }
 0xdae   :  { %5147 = vmatprep.mubr.msk.f32.mxu0 %vm5624_vm3, %v5620_v7 }
 0xdaf   :  { %v6225_v30 = vpop.permute.xlu1 %2603 }
 0xdb0   :  { %3154 = vrot.lane.b32.xlu1 %v6225_v30, %s5625_s19  ;;  %v2614_v47 = vmul.f32 0.35355338, %v6225_v30 }
 0xdb3   :  { %v2693_v32 = vpop.permute.xlu1 %2692 }
 0xdb4   :  { %5141 = vmatpush3.xpose.msk.msra.mxu1 %vm488_vm4, %v2693_v32 }
 0xdb5   :  { %5150 = vmatprep.subr.mxu1 %v5620_v7 }
 0xdb7   :  { %5143 = vmatmul.mubr.msk.f32.vlgmr.msra.gmra.mxu1 %vm488_vm4, %v2608_v33 }
 0xdb8   :  { %5152 = vmatprep.mubr.msk.f32.mxu1 %vm5624_vm3, %v5620_v7 }
 0xe14   :  { %v2847_v35 = vpop.permute.xlu1 %2846 }
 0xe15   :  { %5151 = vmatpush3.xpose.msk.msra.mxu1 %vm488_vm4, %v2847_v35 }
 0xe16   :  { %v2770_v37 = vpop.permute.xlu0 %2769  ;;  %5160 = vmatprep.subr.mxu1 %v5620_v7 }
 0xe17   :  { %5146 = vmatpush3.xpose.msk.msra.mxu0 %vm488_vm4, %v2770_v37 }
 0xe18   :  { %5153 = vmatmul.mubr.msk.f32.vlgmr.msra.gmra.mxu1 %vm488_vm4, %v2610_v36  ;;  %5155 = vmatprep.subr.mxu0 %v5620_v7 }
 0xe19   :  { %5162 = vmatprep.mubr.msk.f32.mxu1 %vm5624_vm3, %v5620_v7 }
 0xe1a   :  { %v2924_v39 = vpop.permute.xlu0 %2923  ;;  %5148 = vmatmul.mubr.msk.f32.vlgmr.msra.gmra.mxu0 %vm488_vm4, %v2609_v38 }
 0xe1b   :  { %5156 = vmatpush3.xpose.msk.msra.mxu0 %vm488_vm4, %v2924_v39  ;;  %5157 = vmatprep.mubr.msk.f32.mxu0 %vm5624_vm3, %v5620_v7 }
 0xe1c   :  { %5165 = vmatprep.subr.mxu0 %v5620_v7 }
 0xe1e   :  { %v3078_v41 = vpop.permute.xlu0 %3077  ;;  %v3001_v42 = vpop.permute.xlu1 %3000  ;;  %5158 = vmatmul.mubr.msk.f32.vlgmr.msra.gmra.mxu0 %vm488_vm4, %v2611_v40 }
 0xe1f   :  { %5161 = vmatpush3.xpose.msk.msra.mxu1 %vm488_vm4, %v3001_v42  ;;  %5166 = vmatpush3.xpose.msk.msra.mxu0 %vm488_vm4, %v3078_v41 }
 0xe20   :  { %5167 = vmatprep.mubr.msk.f32.mxu0 %vm5624_vm3, %v5620_v7  ;;  %5170 = vmatprep.subr.mxu1 %v5620_v7 }
 0xe21   :  { %5175 = vmatprep.subr.mxu0 %v5620_v7 }
 0xe22   :  { %5163 = vmatmul.mubr.msk.f32.vlgmr.msra.gmra.mxu1 %vm488_vm4, %v2612_v44  ;;  %v3155_v45 = vpop.permute.xlu1 %3154  ;;  %5168 = vmatmul.mubr.msk.f32.vlgmr.msra.gmra.mxu0 %vm488_vm4, %v2613_v43 }
 0xe23   :  { %5171 = vmatpush3.xpose.msk.msra.mxu1 %vm488_vm4, %v3155_v45  ;;  %5172 = vmatprep.mubr.msk.f32.mxu1 %vm5624_vm3, %v5620_v7 }
 0xe24   :  { %5180 = vmatprep.subr.mxu1 %v5620_v7  ;;  %5177 = vmatprep.mubr.msk.f32.mxu0 %vm5624_vm3, %v5620_v7 }
 0xe26   :  { %5173 = vmatmul.mubr.msk.f32.vlgmr.msra.gmra.mxu1 %vm488_vm4, %v2614_v47 }
 0xe27   :  { %5182 = vmatprep.mubr.msk.f32.mxu1 %vm5624_vm3, %v5620_v7 }
 0xe6d   :  { %v2688_v49 = vpop.f32.mrf.mxu0 }
 0xe6e   :  { %v2689_v46 = vadd.f32 %v2688_v49, %v5931_v29 }
 0xe6f   :  { %v5139_v51 = vpop.f32.mrf.mxu0 }
 0xe70   :  { %v3231_v52 = vsel %vm488_vm4, %v2689_v46, -inf }
 0xe71   :  { %3232 = vmax.xlane.f32.xlu0 %v3231_v52 }
 0xe77   :  { %v2765_v54 = vpop.f32.mrf.mxu1 }
 0xe78   :  { %v2766_v62 = vadd.f32 %v2765_v54, %v5933_v31 }
 0xe79   :  { %v5144_v63 = vpop.f32.mrf.mxu1 }
 0xe7a   :  { %v3234_v0 = vsel %vm488_vm4, %v2766_v62, -inf }
 0xe7b   :  { %3235 = vmax.xlane.f32.xlu1 %v3234_v0 }
 0xed8   :  { %v2919_v61 = vpop.f32.mrf.mxu1 }
 0xed9   :  { %v2920_v34 = vadd.f32 %v2919_v61, %v5933_v31 }
 0xeda   :  { %v2842_v59 = vpop.f32.mrf.mxu0  ;;  %v5154_v1 = vpop.f32.mrf.mxu1 }
 0xedb   :  { %v2843_v2 = vadd.f32 %v2842_v59, %v5931_v29  ;;  %v3240_v9 = vsel %vm488_vm4, %v2920_v34, -inf }
 0xedc   :  { %v5149_v8 = vpop.f32.mrf.mxu0 }
 0xedd   :  { %v3237_v3 = vsel %vm488_vm4, %v2843_v2, -inf }
 0xede   :  { %3238 = vmax.xlane.f32.xlu0 %v3237_v3  ;;  %v2996_v4 = vpop.f32.mrf.mxu0 }
 0xedf   :  { %v2997_v5 = vadd.f32 %v2996_v4, %v5931_v29 }
 0xee0   :  { %v5159_v6 = vpop.f32.mrf.mxu0 }
 0xee1   :  { %v3243_v10 = vsel %vm488_vm4, %v2997_v5, -inf }
 0xee2   :  { %v3073_v11 = vpop.f32.mrf.mxu1  ;;  %3241 = vmax.xlane.f32.xlu0 %v3240_v9  ;;  %3244 = vmax.xlane.f32.xlu1 %v3243_v10  ;;  %v3150_v12 = vpop.f32.mrf.mxu0 }
 0xee3   :  { %v3074_v13 = vadd.f32 %v3073_v11, %v5933_v31  ;;  %v3151_v55 = vadd.f32 %v3150_v12, %v5931_v29 }
 0xee4   :  { %v5164_v14 = vpop.f32.mrf.mxu1  ;;  %v5169_v57 = vpop.f32.mrf.mxu0 }
 0xee5   :  { %v3246_v56 = vsel %vm488_vm4, %v3074_v13, -inf  ;;  %v3249_v53 = vsel %vm488_vm4, %v3151_v55, -inf }
 0xee6   :  { %v3227_v60 = vpop.f32.mrf.mxu1  ;;  %3247 = vmax.xlane.f32.xlu0 %v3246_v56  ;;  %3250 = vmax.xlane.f32.xlu1 %v3249_v53 }
 0xee7   :  { %v3228_v58 = vadd.f32 %v3227_v60, %v5933_v31 }
 0xee8   :  { %v5174_v15 = vpop.f32.mrf.mxu1 }
 0xee9   :  { %v3252_v16 = vsel %vm488_vm4, %v3228_v58, -inf }
 0xeea   :  { %3253 = vmax.xlane.f32.xlu0 %v3252_v16 }
 0xef7   :  { %3328 = vrot.lane.b32.xlu1 %v6181_v20, %s5627_s18 }
 0xefa   :  { %v3233_v17 = vpop.xlane.xlu0 %3232 }
 0xefb   :  { %3480 = vrot.lane.b32.xlu1 %v6203_v22, %s5627_s18  ;;  %v3255_v19 = vsub.f32 %v2689_v46, %v3233_v17 }
 0xefd   :  { %v3263_v26 = vmul.f32 1.442695, %v3255_v19 }
 0xeff   :  { %3556 = vrot.lane.b32.xlu1 %v6199_v21, %s5627_s18 }
 0xf00   :  { %3404 = vrot.lane.b32.xlu0 %v6179_v18, %s5627_s18 }
 0xf03   :  { %3708 = vrot.lane.b32.xlu1 %v6214_v27, %s5627_s18 }
 0xf04   :  { %3632 = vrot.lane.b32.xlu0 %v6209_v24, %s5627_s18  ;;  %v3236_v29 = vpop.xlane.xlu1 %3235 }
 0xf05   :  { %v3256_v31 = vsub.f32 %v2766_v62, %v3236_v29 }
 0xf07   :  { %v3265_v20 = vmul.f32 1.442695, %v3256_v31 }
 0xf09   :  { %5342 = vpow2.f32 %v3265_v20 }
 0xf0a   :  { %5344 = vpow2.f32 %v3263_v26 }
 0xf16   :  { %v6299_v22 = vpop.eup %5342 }
 0xf17   :  { %v3282_v21 = vsel %vm488_vm4, %v6299_v22, 0.0  ;;  %v6303_v18 = vpop.eup %5344 }
 0xf18   :  { %v3279_v27 = vsel %vm488_vm4, %v6303_v18, 0.0 }
 0xf23   :  { %3283 = vadd.xlane.f32.xlu0 %v3282_v21 }
 0xf27   :  { %3280 = vadd.xlane.f32.xlu1 %v3279_v27 }
 0xf67   :  { %v3239_v24 = vpop.xlane.xlu0 %3238 }
 0xf68   :  { %v3257_v28 = vsub.f32 %v2843_v2, %v3239_v24 }
 0xf6a   :  { %v3267_v32 = vmul.f32 1.442695, %v3257_v28 }
 0xf6b   :  { %v3242_v33 = vpop.xlane.xlu0 %3241  ;;  %v3245_v35 = vpop.xlane.xlu1 %3244 }
 0xf6c   :  { %5346 = vpow2.f32 %v3267_v32  ;;  %v3258_v36 = vsub.f32 %v2920_v34, %v3242_v33  ;;  %v3259_v37 = vsub.f32 %v2997_v5, %v3245_v35  ;;  %v4794_v33 = vld [vmem:[%s6509_s8 + $0x28] sm:$0xff]  ;;  %v4796_v35 = vld [vmem:[%s6509_s8 + $0x38] sm:$0xff] }
 0xf6e   :  { %v3269_v38 = vmul.f32 1.442695, %v3258_v36  ;;  %v3271_v39 = vmul.f32 1.442695, %v3259_v37 }
 0xf6f   :  { %v3248_v40 = vpop.xlane.xlu0 %3247  ;;  %v3251_v41 = vpop.xlane.xlu1 %3250 }
 0xf70   :  { %5348 = vpow2.f32 %v3269_v38  ;;  %v3260_v42 = vsub.f32 %v3074_v13, %v3248_v40  ;;  %v3261_v43 = vsub.f32 %v3151_v55, %v3251_v41 }
 0xf71   :  { %5350 = vpow2.f32 %v3271_v39 }
 0xf72   :  { %v3273_v44 = vmul.f32 1.442695, %v3260_v42  ;;  %v3275_v45 = vmul.f32 1.442695, %v3261_v43 }
 0xf73   :  { %v3254_v47 = vpop.xlane.xlu0 %3253  ;;  %v3329_v49 = vpop.permute.xlu1 %3328 }
 0xf74   :  { %5352 = vpow2.f32 %v3273_v44  ;;  %v3262_v46 = vsub.f32 %v3228_v58, %v3254_v47  ;;  %5176 = vmatpush3.msra.mxu0 %v3329_v49 }
 0xf75   :  { %5354 = vpow2.f32 %v3275_v45  ;;  %5185 = vmatprep.subr.mxu0 %v5620_v7 }
 0xf76   :  { %v3277_v51 = vmul.f32 1.442695, %v3262_v46 }
 0xf77   :  { %v3405_v52 = vpop.permute.xlu0 %3404  ;;  %v3481_v5 = vpop.permute.xlu1 %3480 }
 0xf78   :  { %5356 = vpow2.f32 %v3277_v51  ;;  %5181 = vmatpush3.msra.mxu1 %v3405_v52 }
 0xf79   :  { %v5347_v54 = vpop.eup %5346  ;;  %5190 = vmatprep.subr.mxu1 %v5620_v7 }
 0xf7a   :  { %v3285_v62 = vsel %vm488_vm4, %v5347_v54, 0.0 }
 0xf7b   :  { %3286 = vadd.xlane.f32.xlu1 %v3285_v62  ;;  %v3557_v6 = vpop.permute.xlu1 %3556  ;;  %v3633_v9 = vpop.permute.xlu0 %3632 }
 0xf7d   :  { %v5349_v63 = vpop.eup %5348 }
 0xf7e   :  { %v5351_v0 = vpop.eup %5350  ;;  %v3288_v61 = vsel %vm488_vm4, %v5349_v63, 0.0 }
 0xf7f   :  { %3289 = vadd.xlane.f32.xlu0 %v3288_v61  ;;  %v3291_v59 = vsel %vm488_vm4, %v5351_v0, 0.0  ;;  %v3709_v10 = vpop.permute.xlu1 %3708 }
 0xf80   :  { %3292 = vadd.xlane.f32.xlu1 %v3291_v59 }
 0xf81   :  { %v6312_v1 = vpop.eup %5352 }
 0xf82   :  { %v6314_v2 = vpop.eup %5354  ;;  %v3294_v8 = vsel %vm488_vm4, %v6312_v1, 0.0 }
 0xf83   :  { %3295 = vadd.xlane.f32.xlu0 %v3294_v8  ;;  %v3297_v34 = vsel %vm488_vm4, %v6314_v2, 0.0 }
 0xf84   :  { %3298 = vadd.xlane.f32.xlu1 %v3297_v34 }
 0xf85   :  { %v6320_v3 = vpop.eup %5356 }
 0xf86   :  { %v3300_v4 = vsel %vm488_vm4, %v6320_v3, 0.0 }
 0xf87   :  { %3301 = vadd.xlane.f32.xlu0 %v3300_v4 }
 0xf95   :  { %3860 = vrot.lane.b32.xlu1 %v6225_v30, %s5627_s18 }
 0xf9d   :  { %3784 = vrot.lane.b32.xlu0 %v6207_v23, %s5627_s18 }
 0xfac   :  { %v3284_v11 = vpop.xlane.xlu0 %3283 }
 0xfad   :  { %5358 = vrcp.f32 %v3284_v11 }
 0xfb0   :  { %v3281_v12 = vpop.xlane.xlu1 %3280 }
 0xfb1   :  { %5360 = vrcp.f32 %v3281_v12 }
 0xfba   :  { %v5359_v13 = vpop.eup %5358 }
 0xfbb   :  { %v3312_v55 = vmul.f32 %v5359_v13, %v6299_v22  ;;  %v4793_v22 = vld [vmem:[%s6509_s8 + $0x20] sm:$0xff]  ;;  %v4805_v13 = vld [vmem:[#allocation10 + $0x1] ss:$0 sm:$0xff] }
 0xfbd   :  { %4778 = vst.msk [vmem:[%s6522_s21 + $0x48] sm:$0xff] %vm488_vm4, %v3312_v55  ;;  %5183 = vmatmul.mubr.msk.f32.vlgmr.msra.gmra.mxu1 %vm488_vm4, %v3312_v55 }
 0xfbe   :  { %v5361_v30 = vpop.eup %5360  ;;  %5191 = vmatpush3.msra.mxu1 %v3557_v6  ;;  %5192 = vmatprep.mubr.msk.f32.mxu1 %vm5624_vm3, %v5620_v7 }
 0xfbf   :  { %v3311_v23 = vmul.f32 %v5361_v30, %v6303_v18  ;;  %5200 = vmatprep.subr.mxu1 %v5620_v7 }
 0xfc1   :  { %4777 = vst.msk [vmem:[%s6522_s21 + $0x40] sm:$0xff] %vm488_vm4, %v3311_v23  ;;  %5178 = vmatmul.mubr.msk.f32.vlgmr.msra.gmra.mxu0 %vm488_vm4, %v3311_v23 }
 0xfc2   :  { %5186 = vmatpush3.msra.mxu0 %v3481_v5  ;;  %5187 = vmatprep.mubr.msk.f32.mxu0 %vm5624_vm3, %v5620_v7 }
 0xfc3   :  { %5195 = vmatprep.subr.mxu0 %v5620_v7 }
0x1004   :  { %v3287_v14 = vpop.xlane.xlu1 %3286 }
0x1005   :  { %5362 = vrcp.f32 %v3287_v14 }
0x1008   :  { %v3290_v57 = vpop.xlane.xlu0 %3289 }
0x1009   :  { %5364 = vrcp.f32 %v3290_v57  ;;  %v3293_v56 = vpop.xlane.xlu1 %3292 }
0x100a   :  { %5366 = vrcp.f32 %v3293_v56 }
0x100c   :  { %v3296_v53 = vpop.xlane.xlu0 %3295 }
0x100d   :  { %5368 = vrcp.f32 %v3296_v53  ;;  %v3299_v60 = vpop.xlane.xlu1 %3298 }
0x100e   :  { %5370 = vrcp.f32 %v3299_v60 }
0x1010   :  { %v3302_v58 = vpop.xlane.xlu0 %3301 }
0x1011   :  { %5372 = vrcp.f32 %v3302_v58  ;;  %v3861_v24 = vpop.permute.xlu1 %3860 }
0x1012   :  { %v5363_v15 = vpop.eup %5362 }
0x1013   :  { %v3313_v16 = vmul.f32 %v5363_v15, %v5347_v54 }
0x1014   :  { %v3785_v26 = vpop.permute.xlu0 %3784 }
0x1015   :  { %4779 = vst.msk [vmem:[%s6522_s21 + $0x50] sm:$0xff] %vm488_vm4, %v3313_v16  ;;  %5188 = vmatmul.mubr.msk.f32.vlgmr.msra.gmra.mxu0 %vm488_vm4, %v3313_v16 }
0x1016   :  { %v5365_v29 = vpop.eup %5364  ;;  %5196 = vmatpush3.msra.mxu0 %v3633_v9  ;;  %5197 = vmatprep.mubr.msk.f32.mxu0 %vm5624_vm3, %v5620_v7 }
0x1017   :  { %v5367_v31 = vpop.eup %5366  ;;  %5205 = vmatprep.subr.mxu0 %v5620_v7  ;;  %v3314_v17 = vmul.f32 %v5365_v29, %v5349_v63 }
0x1018   :  { %v3315_v19 = vmul.f32 %v5367_v31, %v5351_v0 }
0x1019   :  { %4780 = vst.msk [vmem:[%s6522_s21 + $0x58] sm:$0xff] %vm488_vm4, %v3314_v17  ;;  %5193 = vmatmul.mubr.msk.f32.vlgmr.msra.gmra.mxu1 %vm488_vm4, %v3314_v17 }
0x101a   :  { %v5369_v20 = vpop.eup %5368  ;;  %4781 = vst.msk [vmem:[%s6522_s21 + $0x60] sm:$0xff] %vm488_vm4, %v3315_v19  ;;  %5198 = vmatmul.mubr.msk.f32.vlgmr.msra.gmra.mxu0 %vm488_vm4, %v3315_v19  ;;  %5201 = vmatpush3.msra.mxu1 %v3709_v10 }
0x101b   :  { %v5371_v21 = vpop.eup %5370  ;;  %5206 = vmatpush3.msra.mxu0 %v3785_v26  ;;  %5202 = vmatprep.mubr.msk.f32.mxu1 %vm5624_vm3, %v5620_v7  ;;  %v3316_v18 = vmul.f32 %v5369_v20, %v6312_v1 }
0x101c   :  { %5207 = vmatprep.mubr.msk.f32.mxu0 %vm5624_vm3, %v5620_v7  ;;  %5210 = vmatprep.subr.mxu1 %v5620_v7  ;;  %v3317_v27 = vmul.f32 %v5371_v21, %v6314_v2 }
0x101d   :  { %4782 = vst.msk [vmem:[%s6522_s21 + $0x68] sm:$0xff] %vm488_vm4, %v3316_v18  ;;  %5203 = vmatmul.mubr.msk.f32.vlgmr.msra.gmra.mxu1 %vm488_vm4, %v3316_v18  ;;  %5215 = vmatprep.subr.mxu0 %v4793_v22 }
0x101e   :  { %v5373_v28 = vpop.eup %5372  ;;  %4783 = vst.msk [vmem:[%s6522_s21 + $0x70] sm:$0xff] %vm488_vm4, %v3317_v27  ;;  %5208 = vmatmul.mubr.msk.f32.vlgmr.msra.gmra.mxu0 %vm488_vm4, %v3317_v27  ;;  %5211 = vmatpush3.msra.mxu1 %v3861_v24  ;;  %v4812_v27 = vld [vmem:[%s6513_s12 + $0x30] sm:$0xff]  ;;  %v4811_v24 = vld [vmem:[%s6513_s12 + $0x28] sm:$0xff] }
0x101f   :  { %5212 = vmatprep.mubr.msk.f32.mxu1 %vm5624_vm3, %v5620_v7  ;;  %v3318_v32 = vmul.f32 %v5373_v28, %v6320_v3  ;;  %5216 = vmatpush3.msra.mxu0 %v4793_v22  ;;  %v4795_v7 = vld [vmem:[%s6509_s8 + $0x30] sm:$0xff]  ;;  %v4810_v28 = vld [vmem:[%s6513_s12 + $0x20] sm:$0xff] }
0x1020   :  { %5220 = vmatprep.subr.mxu1 %v4794_v33  ;;  %5225 = vmatprep.subr.mxu0 %v4795_v7 }
0x1021   :  { %4784 = vst.msk [vmem:[%s6522_s21 + $0x78] sm:$0xff] %vm488_vm4, %v3318_v32  ;;  %5213 = vmatmul.mubr.msk.f32.vlgmr.msra.gmra.mxu1 %vm488_vm4, %v3318_v32 }
0x1022   :  { %5221 = vmatpush3.msra.mxu1 %v4794_v33 }
0x1023   :  { %5230 = vmatprep.subr.mxu1 %v4796_v35 }
0x107d   :  { %v3476_v36 = vpop.f32.mrf.mxu1 }
0x107f   :  { %v5184_v37 = vpop.f32.mrf.mxu1 }
0x1081   :  { %v3400_v38 = vpop.f32.mrf.mxu0 }
0x1082   :  { %5217 = vmatprep.mubr.msk.f32.mxu0 %vm488_vm4, %v3400_v38 }
0x1083   :  { %v5179_v39 = vpop.f32.mrf.mxu0  ;;  %5218 = vmatmul.mubr.msk.f32.vlgmr.msra.gmra.mxu0 %vm488_vm4, %v3476_v36 }
0x1084   :  { %5226 = vmatpush3.msra.mxu0 %v4795_v7  ;;  %v4808_v39 = vld [vmem:[%s6511_s10 + $0x1] ss:$0 sm:$0xff] }
0x10d5   :  { %v3552_v40 = vpop.f32.mrf.mxu0 }
0x10d6   :  { %5222 = vmatprep.mubr.msk.f32.mxu1 %vm488_vm4, %v3552_v40 }
0x10d7   :  { %v5189_v41 = vpop.f32.mrf.mxu0 }
0x10d8   :  { %v4809_v41 = vld [vmem:[%s6512_s11 + $0x1] ss:$0 sm:$0xff] }
0x10d9   :  { %v3628_v42 = vpop.f32.mrf.mxu1 }
0x10da   :  { %v3704_v43 = vpop.f32.mrf.mxu0  ;;  %5223 = vmatmul.mubr.msk.f32.vlgmr.msra.gmra.mxu1 %vm488_vm4, %v3628_v42 }
0x10db   :  { %5227 = vmatprep.mubr.msk.f32.mxu0 %vm488_vm4, %v3704_v43  ;;  %v5194_v44 = vpop.f32.mrf.mxu1  ;;  %5231 = vmatpush3.msra.mxu1 %v4796_v35 }
0x10dc   :  { %v5199_v45 = vpop.f32.mrf.mxu0 }
0x10dd   :  { %v3780_v47 = vpop.f32.mrf.mxu1 }
0x10de   :  { %v3856_v49 = vpop.f32.mrf.mxu0  ;;  %5228 = vmatmul.mubr.msk.f32.vlgmr.msra.gmra.mxu0 %vm488_vm4, %v3780_v47 }
0x10df   :  { %5232 = vmatprep.mubr.msk.f32.mxu1 %vm488_vm4, %v3856_v49  ;;  %v5204_v46 = vpop.f32.mrf.mxu1 }
0x10e0   :  { %v5209_v51 = vpop.f32.mrf.mxu0  ;;  %v4824_v46 = vld [vmem:[%s6515_s14 + $0x78] sm:$0xff] }
0x10e1   :  { %v3932_v52 = vpop.f32.mrf.mxu1  ;;  %5246 = vmatprep.subr.mxu1 %v4824_v46  ;;  %v4823_v51 = vld [vmem:[%s6515_s14 + $0x70] sm:$0xff] }
0x10e2   :  { %5233 = vmatmul.mubr.msk.f32.vlgmr.msra.gmra.mxu1 %vm488_vm4, %v3932_v52  ;;  %v4822_v52 = vld [vmem:[%s6515_s14 + $0x68] sm:$0xff] }
0x10e3   :  { %v5214_v54 = vpop.f32.mrf.mxu1  ;;  %5247 = vmatpush3.msra.mxu1 %v4824_v46 }
0x10e4   :  { %5248 = vmatprep.subr.mxu1 %v4823_v51  ;;  %v4821_v54 = vld [vmem:[%s6515_s14 + $0x60] sm:$0xff] }
0x10e5   :  { %5249 = vmatpush3.msra.mxu1 %v4823_v51 }
0x10e6   :  { %5250 = vmatprep.subr.mxu1 %v4822_v52 }
0x10e7   :  { %5251 = vmatpush3.msra.mxu1 %v4822_v52  ;;  %v4825_v52 = vld [vmem:[#allocation13 + $0x1] ss:$0 sm:$0xff] }
0x10e8   :  { %5252 = vmatprep.subr.mxu1 %v4821_v54 }
0x10e9   :  { %5253 = vmatpush3.msra.mxu1 %v4821_v54 }
0x1143   :  { %v5219_v62 = vpop.f32.mrf.mxu0 }
0x1144   :  { %v4272_v2 = vsel %vm203_vm0, %v5219_v62, 0.0  ;;  %v4820_v62 = vld [vmem:[%s6515_s14 + $0x58] sm:$0xff] }
0x1145   :  { %v4013_v0 = vpop.f32.mrf.mxu0  ;;  %5254 = vmatprep.subr.mxu1 %v4820_v62 }
0x1146   :  { %v4265_v5 = vsel %vm203_vm0, %v4013_v0, 0.0  ;;  %5255 = vmatpush3.msra.mxu1 %v4820_v62  ;;  %v4818_v0 = vld [vmem:[%s6515_s14 + $0x48] sm:$0xff] }
0x119a   :  { %v5224_v63 = vpop.f32.mrf.mxu1 }
0x119b   :  { %v4273_v59 = vsel %vm203_vm0, %v5224_v63, 0.0  ;;  %v4819_v63 = vld [vmem:[%s6515_s14 + $0x50] sm:$0xff] }
0x119c   :  { %v4094_v61 = vpop.f32.mrf.mxu1  ;;  %v4274_v3 = vadd.f32 %v4273_v59, %v4272_v2  ;;  %5256 = vmatprep.subr.mxu1 %v4819_v63  ;;  %v4814_v59 = vld [vmem:[#allocation11 + $0x1] ss:$0 sm:$0xff] }
0x119d   :  { %v4266_v8 = vsel %vm203_vm0, %v4094_v61, 0.0  ;;  %5257 = vmatpush3.msra.mxu1 %v4819_v63  ;;  %v4817_v61 = vld [vmem:[%s6515_s14 + $0x40] sm:$0xff] }
0x119e   :  { %v5229_v1 = vpop.f32.mrf.mxu0  ;;  %v4267_v9 = vadd.f32 %v4266_v8, %v4265_v5  ;;  %5258 = vmatprep.subr.mxu1 %v4818_v0 }
0x119f   :  { %v4275_v34 = vsel %vm203_vm0, %v5229_v1, 0.0  ;;  %5259 = vmatpush3.msra.mxu1 %v4818_v0 }
0x11a0   :  { %v4175_v4 = vpop.f32.mrf.mxu0  ;;  %v4276_v10 = vadd.f32 %v4275_v34, %v4274_v3  ;;  %5260 = vmatprep.subr.mxu1 %v4817_v61 }
0x11a1   :  { %v4268_v6 = vsel %vm203_vm0, %v4175_v4, 0.0  ;;  %5261 = vmatpush3.msra.mxu1 %v4817_v61 }
0x11a2   :  { %v5234_v11 = vpop.f32.mrf.mxu1  ;;  %v4269_v55 = vadd.f32 %v4268_v6, %v4267_v9 }
0x11a3   :  { %v4277_v12 = vsel %vm203_vm0, %v5234_v11, 0.0 }
0x11a4   :  { %v4278_v30 = vadd.f32 %v4277_v12, %v4276_v10  ;;  %v4256_v23 = vpop.f32.mrf.mxu1 }
0x11a5   :  { %v4270_v14 = vsel %vm203_vm0, %v4256_v23, 0.0 }
0x11a6   :  { %v4288_v57 = vadd.f32 %v4805_v13, %v4278_v30  ;;  %v4271_v56 = vadd.f32 %v4270_v14, %v4269_v55 }
0x11a8   :  { %v4287_v53 = vadd.f32 %v4805_v13, %v4271_v56  ;;  %v4290_v60 = vadd.f32 %v4288_v57, %v6171_v48 }
0x11aa   :  { %v4298_v58 = vsel %vm203_vm0, %v4290_v60, 0.0  ;;  %v4289_v15 = vadd.f32 %v4287_v53, %v6169_v50  ;;  %v4813_v50 = vld [vmem:[%s6513_s12 + $0x38] sm:$0xff] }
0x11ab   :  { %4299 = vadd.xlane.f32.xlu1 %v4298_v58  ;;  %5235 = vmatprep.subr.mxu0 %v4813_v50 }
0x11ac   :  { %v4295_v16 = vsel %vm203_vm0, %v4289_v15, 0.0  ;;  %5236 = vmatpush3.msra.mxu0 %v4813_v50 }
0x11ad   :  { %4296 = vadd.xlane.f32.xlu0 %v4295_v16  ;;  %5237 = vmatprep.subr.mxu0 %v4812_v27 }
0x11ae   :  { %5238 = vmatpush3.msra.mxu0 %v4812_v27 }
0x11af   :  { %5239 = vmatprep.subr.mxu0 %v4811_v24 }
0x11b0   :  { %5240 = vmatpush3.msra.mxu0 %v4811_v24 }
0x11b1   :  { %5241 = vmatprep.subr.mxu0 %v4810_v28 }
0x11b2   :  { %5242 = vmatpush3.msra.mxu0 %v4810_v28 }
0x1234   :  { %v4300_v29 = vpop.xlane.xlu1 %4299 }
0x1235   :  { %v4302_v31 = vmul.f32 0.03125, %v4300_v29 }
0x1236   :  { %v4297_v17 = vpop.xlane.xlu0 %4296 }
0x1237   :  { %v4301_v19 = vmul.f32 0.03125, %v4297_v17  ;;  %v4304_v20 = vsub.f32 %v4290_v60, %v4302_v31 }
0x1239   :  { %v4303_v26 = vsub.f32 %v4289_v15, %v4301_v19  ;;  %v4306_v18 = vmul.f32 %v4304_v20, %v4304_v20 }
0x123b   :  { %v4305_v22 = vmul.f32 %v4303_v26, %v4303_v26  ;;  %v4310_v48 = vsel %vm203_vm0, %v4306_v18, 0.0 }
0x123d   :  { %v4307_v21 = vsel %vm203_vm0, %v4305_v22, 0.0 }
0x123e   :  { %4308 = vadd.xlane.f32.xlu0 %v4307_v21 }
0x1242   :  { %4311 = vadd.xlane.f32.xlu0 %v4310_v48 }
0x12c7   :  { %v4309_v32 = vpop.xlane.xlu0 %4308 }
0x12c8   :  { %v4313_v33 = vmul.f32 0.03125, %v4309_v32 }
0x12ca   :  { %v4315_v7 = vadd.f32 1e-12, %v4313_v33 }
0x12cb   :  { %v4312_v35 = vpop.xlane.xlu0 %4311 }
0x12cc   :  { %5374 = vrsqrt.f32 %v4315_v7  ;;  %v4314_v36 = vmul.f32 0.03125, %v4312_v35 }
0x12ce   :  { %v4316_v37 = vadd.f32 1e-12, %v4314_v36 }
0x12d0   :  { %5376 = vrsqrt.f32 %v4316_v37 }
0x12d9   :  { %v5375_v38 = vpop.eup %5374 }
0x12da   :  { %v4319_v40 = vmul.f32 %v5375_v38, %v4303_v26 }
0x12dc   :  { %v4327_v42 = vmul.f32 %v4808_v39, %v4319_v40 }
0x12dd   :  { %v5377_v43 = vpop.eup %5376 }
0x12de   :  { %v4320_v44 = vmul.f32 %v5377_v43, %v4304_v20  ;;  %v6441_v45 = vadd.f32 %v4809_v41, %v4327_v42 }
0x12e0   :  { %v4328_v47 = vmul.f32 %v4808_v39, %v4320_v44  ;;  %5243 = vmatprep.mubr.msk.f32.mxu0 %vm203_vm0, %v6441_v45 }
0x12e2   :  { %v6445_v49 = vadd.f32 %v4809_v41, %v4328_v47 }
0x12e4   :  { %5244 = vmatmul.mubr.msk.f32.vlgmr.msra.gmra.mxu0 %vm203_vm0, %v6445_v49 }
0x13a4   :  { %v5245_v1 = vpop.f32.mrf.mxu0 }
0x13a5   :  { %v4428_v2 = vadd.f32 %v5245_v1, %v4814_v59 }
0x13a6   :  { %v4422_v8 = vpop.f32.mrf.mxu0 }
0x13a7   :  { %v4434_v34 = vmul.f32 0.70710677, %v4428_v2  ;;  %v4423_v3 = vadd.f32 %v4814_v59, %v4422_v8  ;;  %v4432_v47 = vmul.f32 0.5, %v4428_v2 }
0x13a9   :  { %v4440_v4 = vand.u32 2147483647, %v4434_v34  ;;  %v4433_v5 = vmul.f32 0.70710677, %v4423_v3  ;;  %vm4436_vm8 = vcmp.ge.f32.partialorder %v4434_v34, 0.0  ;;  %v4431_v43 = vmul.f32 0.5, %v4423_v3 }
0x13aa   :  { %v4438_v36 = vsel %vm4436_vm8, 1.0, %v5628_v25 }
0x13ab   :  { %v4442_v6 = vmul.f32 0.3275911, %v4440_v4  ;;  %v4439_v9 = vand.u32 2147483647, %v4433_v5  ;;  %v4468_v13 = vsub.f32 0.0, %v4440_v4  ;;  %vm4435_vm9 = vcmp.ge.f32.partialorder %v4433_v5, 0.0 }
0x13ac   :  { %v4437_v40 = vsel %vm4435_vm9, 1.0, %v5628_v25 }
0x13ad   :  { %v4444_v10 = vadd.f32 1.0, %v4442_v6  ;;  %v4441_v11 = vmul.f32 0.3275911, %v4439_v9  ;;  %v4467_v55 = vsub.f32 0.0, %v4439_v9  ;;  %v4470_v30 = vmul.f32 %v4468_v13, %v4440_v4 }
0x13af   :  { %5378 = vrcp.f32 %v4444_v10  ;;  %v4443_v12 = vadd.f32 1.0, %v4441_v11  ;;  %v4469_v14 = vmul.f32 %v4467_v55, %v4439_v9  ;;  %v4473_v56 = vmul.f32 1.442695, %v4470_v30 }
0x13b1   :  { %5380 = vrcp.f32 %v4443_v12  ;;  %v4471_v15 = vmul.f32 1.442695, %v4469_v14  ;;  %v4830_v14 = vld [vmem:[%s6517_s16 + $0x1] ss:$0 sm:$0xff]  ;;  %s5629_s16 = smov [#allocation17]  }
0x13b2   :  { %5382 = vpow2.f32 %v4473_v56 }
0x13b3   :  { %5384 = vpow2.f32 %v4471_v15 }
0x13bc   :  { %v5379_v23 = vpop.eup %5378 }
0x13bd   :  { %v4450_v57 = vmul.f32 1.0614054, %v5379_v23 }
0x13be   :  { %v5381_v53 = vpop.eup %5380 }
0x13bf   :  { %v4452_v60 = vadd.f32 -1.4531521, %v4450_v57  ;;  %v4449_v58 = vmul.f32 1.0614054, %v5381_v53  ;;  %v5383_v24 = vpop.eup %5382 }
0x13c0   :  { %v5385_v7 = vpop.eup %5384 }
0x13c1   :  { %v4454_v16 = vmul.f32 %v5379_v23, %v4452_v60  ;;  %v4451_v29 = vadd.f32 -1.4531521, %v4449_v58 }
0x13c3   :  { %v4456_v31 = vadd.f32 1.4214138, %v4454_v16  ;;  %v4453_v17 = vmul.f32 %v5381_v53, %v4451_v29 }
0x13c5   :  { %v4458_v19 = vmul.f32 %v5379_v23, %v4456_v31  ;;  %v4455_v20 = vadd.f32 1.4214138, %v4453_v17 }
0x13c7   :  { %v4460_v26 = vadd.f32 -0.28449672, %v4458_v19  ;;  %v4457_v22 = vmul.f32 %v5381_v53, %v4455_v20 }
0x13c9   :  { %v4462_v21 = vmul.f32 %v5379_v23, %v4460_v26  ;;  %v4459_v18 = vadd.f32 -0.28449672, %v4457_v22 }
0x13cb   :  { %v4464_v48 = vadd.f32 0.2548296, %v4462_v21  ;;  %v4461_v50 = vmul.f32 %v5381_v53, %v4459_v18 }
0x13cd   :  { %v4466_v27 = vmul.f32 %v5379_v23, %v4464_v48  ;;  %v4463_v28 = vadd.f32 0.2548296, %v4461_v50 }
0x13cf   :  { %v4476_v32 = vmul.f32 %v5383_v24, %v4466_v27  ;;  %v4465_v33 = vmul.f32 %v5381_v53, %v4463_v28  ;;  %v4831_v53 = vld [vmem:[%s6518_s17 + $0x1] ss:$0 sm:$0xff]  ;;  %s4682_s17 = sshll.u32 %s5629_s16, 4  ;;  %s4683_s17 = int_to_ptr.vmem [resolvable:$true] %s4682_s17 }
0x13d0   :  { %s5574_s22 = scalar_lea.vmem %s4683_s17, 256  ;;  %p5579_p4 = scmp.lt.s32.totalorder %s4683_s17, %s4683_s17 }
0x13d1   :  { %v4478_v35 = vsub.f32 1.0, %v4476_v32  ;;  %v4475_v37 = vmul.f32 %v5385_v7, %v4465_v33  ;;  %p5575_p3 = scmp.ne.s32.totalorder %s4683_s17, %s5574_s22  ;;  %p5580_p5 = scmp.lt.s32.totalorder %s5574_s22, %s5574_s22 }
0x13d3   :  { %v4480_v38 = vmul.f32 %v4478_v35, %v4438_v36  ;;  %v4477_v39 = vsub.f32 1.0, %v4475_v37  ;;  %p5581_p6 = por %p5580_p5, %p5579_p4 }
0x13d5   :  { %v4479_v41 = vmul.f32 %v4477_v39, %v4437_v40  ;;  %v4482_v42 = vadd.f32 1.0, %v4480_v38  ;;  %v4832_v38 = vld [vmem:[#allocation14] ss:$0 sm:$0xff]  ;;  %p5582_p7 = pnand %p5581_p6, %p5575_p3 }
0x13d7   :  { %v4481_v44 = vadd.f32 1.0, %v4479_v41  ;;  %v4484_v51 = vmul.f32 %v4482_v42, %v4432_v47  ;;  %v4833_v41 = vld [vmem:[#allocation16] ss:$0 sm:$0xff] }
0x13d9   :  { %v4483_v46 = vmul.f32 %v4481_v44, %v4431_v43 }
0x13db   :  { %5262 = vmatprep.mubr.msk.f32.mxu1 %vm2365_vm7, %v4483_v46 }
0x13dc   :  { %5263 = vmatmul.mubr.msk.f32.vlgmr.msra.gmra.mxu1 %vm2365_vm7, %v4484_v51 }
0x149c   :  { %v5264_v54 = vpop.f32.mrf.mxu1 }
0x149d   :  { %v4580_v62 = vadd.f32 %v5264_v54, %v4825_v52 }
0x149e   :  { %v4574_v63 = vpop.f32.mrf.mxu1 }
0x149f   :  { %v4575_v0 = vadd.f32 %v4825_v52, %v4574_v63  ;;  %v4584_v61 = vadd.f32 %v4580_v62, %v6445_v49 }
0x14a1   :  { %v4583_v25 = vadd.f32 %v4575_v0, %v6441_v45  ;;  %v4592_v59 = vsel %vm203_vm0, %v4584_v61, 0.0 }
0x14a2   :  { %4593 = vadd.xlane.f32.xlu0 %v4592_v59 }
0x14a3   :  { %v4589_v1 = vsel %vm203_vm0, %v4583_v25, 0.0 }
0x14a4   :  { %4590 = vadd.xlane.f32.xlu1 %v4589_v1 }
0x152b   :  { %v4594_v2 = vpop.xlane.xlu0 %4593 }
0x152c   :  { %v4596_v8 = vmul.f32 0.03125, %v4594_v2 }
0x152d   :  { %v4591_v34 = vpop.xlane.xlu1 %4590 }
0x152e   :  { %v4598_v3 = vsub.f32 %v4584_v61, %v4596_v8  ;;  %v4595_v4 = vmul.f32 0.03125, %v4591_v34 }
0x1530   :  { %v4597_v5 = vsub.f32 %v4583_v25, %v4595_v4  ;;  %v4600_v6 = vmul.f32 %v4598_v3, %v4598_v3 }
0x1532   :  { %v4604_v9 = vsel %vm203_vm0, %v4600_v6, 0.0  ;;  %v4599_v10 = vmul.f32 %v4597_v5, %v4597_v5 }
0x1533   :  { %4605 = vadd.xlane.f32.xlu0 %v4604_v9 }
0x1534   :  { %v4601_v49 = vsel %vm203_vm0, %v4599_v10, 0.0 }
0x1535   :  { %4602 = vadd.xlane.f32.xlu1 %v4601_v49 }
0x15bc   :  { %v4606_v45 = vpop.xlane.xlu0 %4605 }
0x15bd   :  { %v4608_v11 = vmul.f32 0.03125, %v4606_v45 }
0x15be   :  { %v4603_v12 = vpop.xlane.xlu1 %4602 }
0x15bf   :  { %v4610_v13 = vadd.f32 1e-12, %v4608_v11  ;;  %v4607_v55 = vmul.f32 0.03125, %v4603_v12 }
0x15c1   :  { %5386 = vrsqrt.f32 %v4610_v13  ;;  %v4609_v30 = vadd.f32 1e-12, %v4607_v55 }
0x15c3   :  { %5388 = vrsqrt.f32 %v4609_v30 }
0x15ce   :  { %v5387_v23 = vpop.eup %5386 }
0x15cf   :  { %v4614_v57 = vmul.f32 %v5387_v23, %v4598_v3 }
0x15d0   :  { %v5389_v56 = vpop.eup %5388 }
0x15d1   :  { %v4622_v60 = vmul.f32 %v4830_v14, %v4614_v57  ;;  %v4613_v58 = vmul.f32 %v5389_v56, %v4597_v5 }
0x15d3   :  { %v4630_v15 = vadd.f32 %v4831_v53, %v4622_v60  ;;  %v4621_v16 = vmul.f32 %v4830_v14, %v4613_v58 }
0x15d5   :  { %v4636_v29 = vsel %vm203_vm0, %v4630_v15, 0.0  ;;  %v4629_v31 = vadd.f32 %v4831_v53, %v4621_v16 }
0x15d6   :  { %4637 = vadd.xlane.f32.xlu0 %v4636_v29 }
0x15d7   :  { %v4633_v17 = vsel %vm203_vm0, %v4629_v31, 0.0 }
0x15d8   :  { %4634 = vadd.xlane.f32.xlu1 %v4633_v17 }
0x165f   :  { %v4638_v19 = vpop.xlane.xlu0 %4637 }
0x1660   :  { %v4640_v20 = vmul.f32 0.03125, %v4638_v19 }
0x1661   :  { %v4635_v26 = vpop.xlane.xlu1 %4634 }
0x1662   :  { %v4642_v22 = vsub.f32 %v4630_v15, %v4640_v20  ;;  %v4639_v21 = vmul.f32 0.03125, %v4635_v26 }
0x1664   :  { %v4641_v18 = vsub.f32 %v4629_v31, %v4639_v21  ;;  %v4644_v48 = vmul.f32 %v4642_v22, %v4642_v22 }
0x1666   :  { %v4648_v50 = vsel %vm203_vm0, %v4644_v48, 0.0  ;;  %v4643_v27 = vmul.f32 %v4641_v18, %v4641_v18 }
0x1667   :  { %4649 = vadd.xlane.f32.xlu0 %v4648_v50 }
0x1668   :  { %v4645_v24 = vsel %vm203_vm0, %v4643_v27, 0.0 }
0x1669   :  { %4646 = vadd.xlane.f32.xlu1 %v4645_v24 }
0x16f0   :  { %v4650_v28 = vpop.xlane.xlu0 %4649 }
0x16f1   :  { %v4652_v32 = vmul.f32 0.03125, %v4650_v28 }
0x16f2   :  { %v4647_v33 = vpop.xlane.xlu1 %4646 }
0x16f3   :  { %v4654_v7 = vadd.f32 1e-12, %v4652_v32  ;;  %v4651_v35 = vmul.f32 0.03125, %v4647_v33 }
0x16f5   :  { %5390 = vrsqrt.f32 %v4654_v7  ;;  %v4653_v36 = vadd.f32 1e-12, %v4651_v35 }
0x16f7   :  { %5392 = vrsqrt.f32 %v4653_v36 }
0x1702   :  { %v5391_v37 = vpop.eup %5390 }
0x1703   :  { %v4658_v39 = vmul.f32 %v5391_v37, %v4642_v22 }
0x1704   :  { %v5393_v40 = vpop.eup %5392 }
0x1705   :  { %v4657_v42 = vmul.f32 %v5393_v40, %v4641_v18  ;;  %v4666_v43 = vmul.f32 %v4832_v38, %v4658_v39 }
0x1707   :  { %v4665_v44 = vmul.f32 %v4832_v38, %v4657_v42  ;;  %v4674_v47 = vadd.f32 %v4833_v41, %v4666_v43 }
0x1709   :  { %v4673_v46 = vadd.f32 %v4833_v41, %v4665_v44  ;;  %4676 = vst.msk [vmem:[#allocation17 + $0x8] sm:$0xff] %vm203_vm0, %v4674_v47 }
0x170b   :  { %4675 = vst.msk [vmem:[#allocation17] sm:$0xff] %vm203_vm0, %v4673_v46 }
0x170c   :  { %5585 = shalt.err (!%p5582_p7)
}
0x170d   :  { %4688 = dma.vmem_to_hbm [thread:$0]  %s4683_s17, 256, %s6521_s20, [#allocation4], %s5613_s13, %s5613_s13, %s5614_s24  }
0x170e   :  { %5604 = dma.done.wait [#allocation4], 256  }
0x170f   :  { %5605 = vsyncadd [#allocation4], 4294967040 }
0x1710   :  { %4696 = vsyncpa [#allocation3], 1 }
0x1711   :  { %4697 = vsyncpa [#allocation6], 1 }
0x1712   :  { %4698 = vsyncpa [#allocation9], 1 }
0x1713   :  { %4699 = vsyncpa [#allocation12], 1 }
0x1714   :  { %4700 = vsyncpa [#allocation15], 1 }
0x1715   :  { %4701 = vsyncpa [#allocation4], 1 }

</bundles_post_ra>
